<compile_context>
chip_gen: v7x
topology: tpu7x:2x2x1
jax: 0.10.0
libtpu: 0.0.40
codegen_flags: <defaults>
</compile_context>

<pallas_src>
import math

import jax
import jax.numpy as jnp
from jax.experimental import pallas as pl
from jax.experimental.pallas import tpu as pltpu

# ----------------------------- model config ---------------------------------
B = 2          # batch
S = 8          # sequence length
D = 32         # d_model
H = 4          # number of heads
DK = D // H    # per-head dim
DFF = 64       # feed-forward hidden dim
N_LAYERS = 2   # number of stacked encoder layers
EPS = 1e-6     # LayerNorm eps (Annotated Transformer uses 1e-6)
R = B * S      # total rows processed per grid step


# ------------------------------ Pallas kernel --------------------------------
def _layer_norm(t, g, b):
    # torch: a_2 * (x - mean) / (x.std(-1, unbiased=True) + eps) + b_2
    mean = jnp.mean(t, axis=-1, keepdims=True)
    var = jnp.sum((t - mean) ** 2, axis=-1, keepdims=True) * (1.0 / (D - 1))
    inv = pl.reciprocal(jnp.sqrt(var) + EPS, approx=False)   # EUP, exact
    return g * (t - mean) * inv + b


def encoder_kernel(
    x_ref, nb_ref,                            # activations + additive mask bias
    g1_ref, b1_ref,                           # layer-norm 1 (before self-attn)
    wqkv_ref, bqkv_ref,                       # fused Q|K|V projection
    wo_ref, bo_ref,                           # attention output projection
    g2_ref, b2_ref,                           # layer-norm 2 (before FFN)
    w1_ref, bb1_ref, w2_ref, bb2_ref,         # FFN weights
    o_ref,
    x_scr,                                    # VMEM-resident activations
):
    l = pl.program_id(0)

    @pl.when(l == 0)
    def _():
        x_scr[...] = x_ref[...].astype(jnp.float32)

    x = x_scr[...]                            # (R, D)
    neg = nb_ref[...]                         # (B, 1, S) additive mask bias

    # ---- sublayer 1: x + SelfAttn(LayerNorm(x)) -----------------------------
    xn = _layer_norm(x, g1_ref[0], b1_ref[0])
    qkv = jnp.dot(xn, wqkv_ref[0], preferred_element_type=jnp.float32) + bqkv_ref[0]
    q = qkv[:, 0 * D:1 * D]
    k = qkv[:, 1 * D:2 * D]
    v = qkv[:, 2 * D:3 * D]

    scale = 1.0 / math.sqrt(DK)
    batch_outs = []
    for b in range(B):                        # static unroll, B = 2
        r0 = b * S
        qb = q[r0:r0 + S, :]
        kb = k[r0:r0 + S, :]
        vb = v[r0:r0 + S, :]
        mrow = neg[b]                         # (1, S), broadcasts over query rows
        head_outs = []
        for h in range(H):                    # static unroll, H = 4
            c0 = h * DK
            sc = jnp.dot(qb[:, c0:c0 + DK], kb[:, c0:c0 + DK].T,
                         preferred_element_type=jnp.float32) * scale + mrow
            sc = sc - jnp.max(sc, axis=-1, keepdims=True)
            e = jnp.exp(sc)
            p = e * pl.reciprocal(jnp.sum(e, axis=-1, keepdims=True), approx=False)
            head_outs.append(jnp.dot(p, vb[:, c0:c0 + DK],
                                     preferred_element_type=jnp.float32))
        batch_outs.append(jnp.concatenate(head_outs, axis=-1))    # (S, D)
    attn = jnp.concatenate(batch_outs, axis=0)                    # (R, D)
    attn = jnp.dot(attn, wo_ref[0], preferred_element_type=jnp.float32) + bo_ref[0]
    x1 = x + attn

    # ---- sublayer 2: x + FFN(LayerNorm(x)) ----------------------------------
    xn2 = _layer_norm(x1, g2_ref[0], b2_ref[0])
    hid = jnp.dot(xn2, w1_ref[0], preferred_element_type=jnp.float32) + bb1_ref[0]
    hid = jnp.maximum(hid, 0.0)                                   # ReLU
    ff = jnp.dot(hid, w2_ref[0], preferred_element_type=jnp.float32) + bb2_ref[0]
    x_new = x1 + ff

    x_scr[...] = x_new                         # carry to next layer (VMEM)

    @pl.when(l == pl.num_programs(0) - 1)
    def _():
        o_ref[...] = x_new.astype(o_ref.dtype)


# ------------------------------ host wrapper ---------------------------------
def _stack_params(layer_params_list):
    """Fuse Q/K/V per layer and stack every parameter along a layer axis."""
    def fuse(p):
        (g1, b1, wq, bq, wk, bk, wv, bv, wo, bo, g2, b2, w1, bb1, w2, bb2) = p
        wqkv = jnp.concatenate([wq, wk, wv], axis=1)    # (D, 3D)
        bqkv = jnp.concatenate([bq, bk, bv], axis=1)    # (1, 3D)
        return (g1, b1, wqkv, bqkv, wo, bo, g2, b2, w1, bb1, w2, bb2)

    fused = [fuse(p) for p in layer_params_list]
    return tuple(jnp.stack([f[i] for f in fused], axis=0) for i in range(12))


@jax.jit
def encoder(x, mask, layer_params_list):
    """Encoder.forward: pass x (and mask) through each layer in turn."""
    stacked = _stack_params(layer_params_list)
    x2 = x.reshape(R, D)
    # Additive mask bias, computed once on the host: 0 where visible, -1e9 where masked.
    negbias = jnp.where(mask == 0.0, -1e9, 0.0).astype(jnp.float32)   # (B, 1, S)

    def stacked_spec(p):
        _, r, c = p.shape
        return pl.BlockSpec((1, r, c), lambda l: (l, 0, 0))

    out2 = pl.pallas_call(
        encoder_kernel,
        out_shape=jax.ShapeDtypeStruct((R, D), x.dtype),
        grid_spec=pltpu.PrefetchScalarGridSpec(
            num_scalar_prefetch=0,
            grid=(N_LAYERS,),
            in_specs=[
                pl.BlockSpec((R, D), lambda l: (0, 0)),        # x (whole batch)
                pl.BlockSpec((B, 1, S), lambda l: (0, 0, 0)),  # mask bias
            ] + [stacked_spec(p) for p in stacked],            # layer-indexed weights
            out_specs=pl.BlockSpec((R, D), lambda l: (0, 0)),
            scratch_shapes=[pltpu.VMEM((R, D), jnp.float32)],
        ),
        compiler_params=pltpu.CompilerParams(
            dimension_semantics=("arbitrary",)),
    )(x2, negbias, *stacked)
    return out2.reshape(B, S, D)


# -------------------------- pure-JAX reference -------------------------------
def _ref_layer(x, mask, params):
    (g1, b1, wq, bq, wk, bk, wv, bv, wo, bo, g2, b2, w1, bb1, w2, bb2) = params

    def ln(x, g, b):
        mean = jnp.mean(x, axis=-1, keepdims=True)
        var = jnp.sum((x - mean) ** 2, axis=-1, keepdims=True) / (D - 1)
        return g * (x - mean) / (jnp.sqrt(var) + EPS) + b

    xn = ln(x, g1, b1)
    q = xn @ wq + bq
    k = xn @ wk + bk
    v = xn @ wv + bv
    qh = q.reshape(B, S, H, DK).transpose(0, 2, 1, 3)
    kh = k.reshape(B, S, H, DK).transpose(0, 2, 1, 3)
    vh = v.reshape(B, S, H, DK).transpose(0, 2, 1, 3)
    s = jnp.einsum("bhqd,bhkd->bhqk", qh, kh) / math.sqrt(DK)
    s = jnp.where(mask[:, None, :, :] == 0.0, -1e9, s)   # (B,1,1,S) broadcast
    p = jax.nn.softmax(s, axis=-1)
    a = jnp.einsum("bhqk,bhkd->bhqd", p, vh).transpose(0, 2, 1, 3).reshape(B, S, D)
    x1 = x + (a @ wo + bo)

    xn2 = ln(x1, g2, b2)
    ff = jnp.maximum(xn2 @ w1 + bb1, 0.0) @ w2 + bb2
    return x1 + ff


def _ref_encoder(x, mask, layer_params_list):
    for params in layer_params_list:
        x = _ref_layer(x, mask, params)
    return x


# ------------------------------- parameters ----------------------------------
def make_layer_params(key):
    ks = jax.random.split(key, 12)
    s_d = 1.0 / math.sqrt(D)
    s_f = 1.0 / math.sqrt(DFF)
    g1 = jnp.ones((1, D), jnp.float32)
    b1 = jnp.zeros((1, D), jnp.float32)
    g2 = jnp.ones((1, D), jnp.float32)
    b2 = jnp.zeros((1, D), jnp.float32)
    wq = jax.random.uniform(ks[0], (D, D), jnp.float32, -s_d, s_d)
    bq = jax.random.uniform(ks[1], (1, D), jnp.float32, -s_d, s_d)
    wk = jax.random.uniform(ks[2], (D, D), jnp.float32, -s_d, s_d)
    bk = jax.random.uniform(ks[3], (1, D), jnp.float32, -s_d, s_d)
    wv = jax.random.uniform(ks[4], (D, D), jnp.float32, -s_d, s_d)
    bv = jax.random.uniform(ks[5], (1, D), jnp.float32, -s_d, s_d)
    wo = jax.random.uniform(ks[6], (D, D), jnp.float32, -s_d, s_d)
    bo = jax.random.uniform(ks[7], (1, D), jnp.float32, -s_d, s_d)
    w1 = jax.random.uniform(ks[8], (D, DFF), jnp.float32, -s_d, s_d)
    bb1 = jax.random.uniform(ks[9], (1, DFF), jnp.float32, -s_d, s_d)
    w2 = jax.random.uniform(ks[10], (DFF, D), jnp.float32, -s_f, s_f)
    bb2 = jax.random.uniform(ks[11], (1, D), jnp.float32, -s_f, s_f)
    return (g1, b1, wq, bq, wk, bk, wv, bv, wo, bo, g2, b2, w1, bb1, w2, bb2)


if __name__ == "__main__":
    key = jax.random.PRNGKey(0)
    kx, kp = jax.random.split(key)

    x = jax.random.normal(kx, (B, S, D), jnp.float32)

    # padding-style mask: batch 0 attends to all 8 positions, batch 1 to first 5
    lengths = jnp.array([8, 5])
    pos = jnp.arange(S)[None, None, :]                         # (1,1,S)
    mask = (pos < lengths[:, None, None]).astype(jnp.float32)  # (B,1,S)

    layer_keys = jax.random.split(kp, N_LAYERS)
    layer_params_list = [make_layer_params(k) for k in layer_keys]

    out = encoder(x, mask, layer_params_list)
    out = jax.block_until_ready(out)

    ref = _ref_encoder(x, mask, layer_params_list)
    assert out.shape == (B, S, D)
    assert jnp.allclose(out, ref, atol=1e-4, rtol=1e-4), (
        f"max abs err {jnp.max(jnp.abs(out - ref))}")

    print("KERNEL_OK")
</pallas_src>

<mosaic_0001>
module attributes {stable_mosaic.version = 11 : i64} {
  func.func @encoder_kernel(%arg0: i32, %arg1: memref<16x32xf32, #tpu.memory_space<vmem>>, %arg2: memref<2x1x8xf32, #tpu.memory_space<vmem>>, %arg3: memref<1x1x32xf32, #tpu.memory_space<vmem>>, %arg4: memref<1x1x32xf32, #tpu.memory_space<vmem>>, %arg5: memref<1x32x96xf32, #tpu.memory_space<vmem>>, %arg6: memref<1x1x96xf32, #tpu.memory_space<vmem>>, %arg7: memref<1x32x32xf32, #tpu.memory_space<vmem>>, %arg8: memref<1x1x32xf32, #tpu.memory_space<vmem>>, %arg9: memref<1x1x32xf32, #tpu.memory_space<vmem>>, %arg10: memref<1x1x32xf32, #tpu.memory_space<vmem>>, %arg11: memref<1x32x64xf32, #tpu.memory_space<vmem>>, %arg12: memref<1x1x64xf32, #tpu.memory_space<vmem>>, %arg13: memref<1x64x32xf32, #tpu.memory_space<vmem>>, %arg14: memref<1x1x32xf32, #tpu.memory_space<vmem>>, %arg15: memref<16x32xf32, #tpu.memory_space<vmem>>, %arg16: memref<16x32xf32, #tpu.memory_space<vmem>>) attributes {dimension_semantics = [#tpu.dimension_semantics<arbitrary>], iteration_bounds = array<i64: 2>, scalar_prefetch = 0 : i64, scratch_operands = 1 : i64, tpu.core_type = #tpu.core_type<tc>, window_params = [{pipeline_mode = #tpu.pipeline_mode<synchronous>, transform_indices = @transform_0, window_bounds = array<i64: 16, 32>}, {pipeline_mode = #tpu.pipeline_mode<synchronous>, transform_indices = @transform_1, window_bounds = array<i64: 2, 1, 8>}, {transform_indices = @transform_2, window_bounds = array<i64: 1, 1, 32>}, {transform_indices = @transform_3, window_bounds = array<i64: 1, 1, 32>}, {transform_indices = @transform_4, window_bounds = array<i64: 1, 32, 96>}, {transform_indices = @transform_5, window_bounds = array<i64: 1, 1, 96>}, {transform_indices = @transform_6, window_bounds = array<i64: 1, 32, 32>}, {transform_indices = @transform_7, window_bounds = array<i64: 1, 1, 32>}, {transform_indices = @transform_8, window_bounds = array<i64: 1, 1, 32>}, {transform_indices = @transform_9, window_bounds = array<i64: 1, 1, 32>}, {transform_indices = @transform_10, window_bounds = array<i64: 1, 32, 64>}, {transform_indices = @transform_11, window_bounds = array<i64: 1, 1, 64>}, {transform_indices = @transform_12, window_bounds = array<i64: 1, 64, 32>}, {transform_indices = @transform_13, window_bounds = array<i64: 1, 1, 32>}, {pipeline_mode = #tpu.pipeline_mode<synchronous>, transform_indices = @transform_14, window_bounds = array<i64: 16, 32>}]} {
    %c0_i32 = arith.constant 0 : i32
    %0 = arith.cmpi eq, %arg0, %c0_i32 : i32
    %1 = arith.extui %0 : i1 to i32
    %c0_i32_0 = arith.constant 0 : i32
    %2 = arith.cmpi ne, %1, %c0_i32_0 : i32
    scf.if %2 {
      %c0_98 = arith.constant 0 : index
      %c0_99 = arith.constant 0 : index
      %271 = vector.load %arg1[%c0_98, %c0_99] : memref<16x32xf32, #tpu.memory_space<vmem>>, vector<16x32xf32>
      %c0_100 = arith.constant 0 : index
      %c0_101 = arith.constant 0 : index
      %272 = vector.load %arg16[%c0_100, %c0_101] : memref<16x32xf32, #tpu.memory_space<vmem>>, vector<16x32xf32>
      tpu.vector_store %arg16[%c0_100, %c0_101], %271 {strides = array<i32>} : memref<16x32xf32, #tpu.memory_space<vmem>>, vector<16x32xf32>,
    } else {
    }
    %c0 = arith.constant 0 : index
    %c0_1 = arith.constant 0 : index
    %3 = vector.load %arg16[%c0, %c0_1] : memref<16x32xf32, #tpu.memory_space<vmem>>, vector<16x32xf32>
    %c0_2 = arith.constant 0 : index
    %c0_3 = arith.constant 0 : index
    %c0_4 = arith.constant 0 : index
    %4 = vector.load %arg2[%c0_2, %c0_3, %c0_4] : memref<2x1x8xf32, #tpu.memory_space<vmem>>, vector<2x1x8xf32>
    %c0_5 = arith.constant 0 : index
    %c0_6 = arith.constant 0 : index
    %c0_7 = arith.constant 0 : index
    %5 = vector.load %arg3[%c0_5, %c0_6, %c0_7] : memref<1x1x32xf32, #tpu.memory_space<vmem>>, vector<1x1x32xf32>
    %6 = vector.shape_cast %5 : vector<1x1x32xf32> to vector<1x32xf32>
    %c0_8 = arith.constant 0 : index
    %c0_9 = arith.constant 0 : index
    %c0_10 = arith.constant 0 : index
    %7 = vector.load %arg4[%c0_8, %c0_9, %c0_10] : memref<1x1x32xf32, #tpu.memory_space<vmem>>, vector<1x1x32xf32>
    %8 = vector.shape_cast %7 : vector<1x1x32xf32> to vector<1x32xf32>
    %cst = arith.constant dense<0.000000e+00> : vector<16xf32>
    %9 = vector.multi_reduction <add>, %3, %cst [1] : vector<16x32xf32> to vector<16xf32>
    %10 = vector.shape_cast %9 : vector<16xf32> to vector<16x1xf32>
    %cst_11 = arith.constant 3.200000e+01 : f32
    %11 = vector.broadcast %cst_11 : f32 to vector<16x1xf32>
    %12 = arith.divf %10, %11 : vector<16x1xf32>
    %13 = vector.broadcast %12 : vector<16x1xf32> to vector<16x32xf32>
    %14 = arith.subf %3, %13 : vector<16x32xf32>
    %15 = arith.mulf %14, %14 : vector<16x32xf32>
    %cst_12 = arith.constant dense<0.000000e+00> : vector<16xf32>
    %16 = vector.multi_reduction <add>, %15, %cst_12 [1] : vector<16x32xf32> to vector<16xf32>
    %17 = vector.shape_cast %16 : vector<16xf32> to vector<16x1xf32>
    %cst_13 = arith.constant 0.0322580636 : f32
    %18 = vector.broadcast %cst_13 : f32 to vector<16x1xf32>
    %19 = arith.mulf %17, %18 : vector<16x1xf32>
    %20 = math.sqrt %19 : vector<16x1xf32>
    %cst_14 = arith.constant 9.99999997E-7 : f32
    %21 = vector.broadcast %cst_14 : f32 to vector<16x1xf32>
    %22 = arith.addf %20, %21 : vector<16x1xf32>
    %23 = tpu.reciprocal %22 : vector<16x1xf32> -> vector<16x1xf32>
    %24 = vector.broadcast %12 : vector<16x1xf32> to vector<16x32xf32>
    %25 = arith.subf %3, %24 : vector<16x32xf32>
    %26 = vector.broadcast %6 : vector<1x32xf32> to vector<16x32xf32>
    %27 = arith.mulf %26, %25 : vector<16x32xf32>
    %28 = vector.broadcast %23 : vector<16x1xf32> to vector<16x32xf32>
    %29 = arith.mulf %27, %28 : vector<16x32xf32>
    %30 = vector.broadcast %8 : vector<1x32xf32> to vector<16x32xf32>
    %31 = arith.addf %29, %30 : vector<16x32xf32>
    %c0_15 = arith.constant 0 : index
    %c0_16 = arith.constant 0 : index
    %c0_17 = arith.constant 0 : index
    %32 = vector.load %arg5[%c0_15, %c0_16, %c0_17] : memref<1x32x96xf32, #tpu.memory_space<vmem>>, vector<1x32x96xf32>
    %33 = vector.shape_cast %32 : vector<1x32x96xf32> to vector<32x96xf32>
    %cst_18 = arith.constant dense<0.000000e+00> : vector<16x96xf32>
    %34 = tpu.matmul %31, %33, %cst_18 {dimension_numbers = #tpu.dot_dimension_numbers<[1], [0], [0], [1], [0, 0, 1, 1], [], []>} : vector<16x32xf32>, vector<32x96xf32>, vector<16x96xf32> -> vector<16x96xf32>
    %c0_19 = arith.constant 0 : index
    %c0_20 = arith.constant 0 : index
    %c0_21 = arith.constant 0 : index
    %35 = vector.load %arg6[%c0_19, %c0_20, %c0_21] : memref<1x1x96xf32, #tpu.memory_space<vmem>>, vector<1x1x96xf32>
    %36 = vector.shape_cast %35 : vector<1x1x96xf32> to vector<1x96xf32>
    %37 = vector.broadcast %36 : vector<1x96xf32> to vector<16x96xf32>
    %38 = arith.addf %34, %37 : vector<16x96xf32>
    %39 = vector.extract_strided_slice %38 {offsets = [0, 0], sizes = [16, 32], strides = [1, 1]} : vector<16x96xf32> to vector<16x32xf32>
    %40 = vector.extract_strided_slice %38 {offsets = [0, 32], sizes = [16, 32], strides = [1, 1]} : vector<16x96xf32> to vector<16x32xf32>
    %41 = vector.extract_strided_slice %38 {offsets = [0, 64], sizes = [16, 32], strides = [1, 1]} : vector<16x96xf32> to vector<16x32xf32>
    %42 = vector.extract_strided_slice %39 {offsets = [0, 0], sizes = [8, 32], strides = [1, 1]} : vector<16x32xf32> to vector<8x32xf32>
    %43 = vector.extract_strided_slice %40 {offsets = [0, 0], sizes = [8, 32], strides = [1, 1]} : vector<16x32xf32> to vector<8x32xf32>
    %44 = vector.extract_strided_slice %41 {offsets = [0, 0], sizes = [8, 32], strides = [1, 1]} : vector<16x32xf32> to vector<8x32xf32>
    %45 = vector.extract_strided_slice %4 {offsets = [0, 0, 0], sizes = [1, 1, 8], strides = [1, 1, 1]} : vector<2x1x8xf32> to vector<1x1x8xf32>
    %46 = vector.shape_cast %45 : vector<1x1x8xf32> to vector<1x8xf32>
    %47 = vector.extract_strided_slice %42 {offsets = [0, 0], sizes = [8, 8], strides = [1, 1]} : vector<8x32xf32> to vector<8x8xf32>
    %48 = vector.extract_strided_slice %43 {offsets = [0, 0], sizes = [8, 8], strides = [1, 1]} : vector<8x32xf32> to vector<8x8xf32>
    %49 = tpu.transpose %48, [1, 0] : vector<8x8xf32> -> vector<8x8xf32>
    %cst_22 = arith.constant dense<0.000000e+00> : vector<8x8xf32>
    %50 = tpu.matmul %47, %49, %cst_22 {dimension_numbers = #tpu.dot_dimension_numbers<[1], [0], [0], [1], [0, 0, 1, 1], [], []>} : vector<8x8xf32>, vector<8x8xf32>, vector<8x8xf32> -> vector<8x8xf32>
    %cst_23 = arith.constant 0.353553385 : f32
    %51 = vector.broadcast %cst_23 : f32 to vector<8x8xf32>
    %52 = arith.mulf %50, %51 : vector<8x8xf32>
    %53 = vector.broadcast %46 : vector<1x8xf32> to vector<8x8xf32>
    %54 = arith.addf %52, %53 : vector<8x8xf32>
    %cst_24 = arith.constant dense<0xFF800000> : vector<8xf32>
    %55 = vector.multi_reduction <maximumf>, %54, %cst_24 [1] : vector<8x8xf32> to vector<8xf32>
    %56 = vector.shape_cast %55 : vector<8xf32> to vector<8x1xf32>
    %57 = vector.broadcast %56 : vector<8x1xf32> to vector<8x8xf32>
    %58 = arith.subf %54, %57 : vector<8x8xf32>
    %59 = math.exp %58 : vector<8x8xf32>
    %cst_25 = arith.constant dense<0.000000e+00> : vector<8xf32>
    %60 = vector.multi_reduction <add>, %59, %cst_25 [1] : vector<8x8xf32> to vector<8xf32>
    %61 = vector.shape_cast %60 : vector<8xf32> to vector<8x1xf32>
    %62 = tpu.reciprocal %61 : vector<8x1xf32> -> vector<8x1xf32>
    %63 = vector.broadcast %62 : vector<8x1xf32> to vector<8x8xf32>
    %64 = arith.mulf %59, %63 : vector<8x8xf32>
    %65 = vector.extract_strided_slice %44 {offsets = [0, 0], sizes = [8, 8], strides = [1, 1]} : vector<8x32xf32> to vector<8x8xf32>
    %cst_26 = arith.constant dense<0.000000e+00> : vector<8x8xf32>
    %66 = tpu.matmul %64, %65, %cst_26 {dimension_numbers = #tpu.dot_dimension_numbers<[1], [0], [0], [1], [0, 0, 1, 1], [], []>} : vector<8x8xf32>, vector<8x8xf32>, vector<8x8xf32> -> vector<8x8xf32>
    %67 = vector.extract_strided_slice %42 {offsets = [0, 8], sizes = [8, 8], strides = [1, 1]} : vector<8x32xf32> to vector<8x8xf32>
    %68 = vector.extract_strided_slice %43 {offsets = [0, 8], sizes = [8, 8], strides = [1, 1]} : vector<8x32xf32> to vector<8x8xf32>
    %69 = tpu.transpose %68, [1, 0] : vector<8x8xf32> -> vector<8x8xf32>
    %cst_27 = arith.constant dense<0.000000e+00> : vector<8x8xf32>
    %70 = tpu.matmul %67, %69, %cst_27 {dimension_numbers = #tpu.dot_dimension_numbers<[1], [0], [0], [1], [0, 0, 1, 1], [], []>} : vector<8x8xf32>, vector<8x8xf32>, vector<8x8xf32> -> vector<8x8xf32>
    %cst_28 = arith.constant 0.353553385 : f32
    %71 = vector.broadcast %cst_28 : f32 to vector<8x8xf32>
    %72 = arith.mulf %70, %71 : vector<8x8xf32>
    %73 = vector.broadcast %46 : vector<1x8xf32> to vector<8x8xf32>
    %74 = arith.addf %72, %73 : vector<8x8xf32>
    %cst_29 = arith.constant dense<0xFF800000> : vector<8xf32>
    %75 = vector.multi_reduction <maximumf>, %74, %cst_29 [1] : vector<8x8xf32> to vector<8xf32>
    %76 = vector.shape_cast %75 : vector<8xf32> to vector<8x1xf32>
    %77 = vector.broadcast %76 : vector<8x1xf32> to vector<8x8xf32>
    %78 = arith.subf %74, %77 : vector<8x8xf32>
    %79 = math.exp %78 : vector<8x8xf32>
    %cst_30 = arith.constant dense<0.000000e+00> : vector<8xf32>
    %80 = vector.multi_reduction <add>, %79, %cst_30 [1] : vector<8x8xf32> to vector<8xf32>
    %81 = vector.shape_cast %80 : vector<8xf32> to vector<8x1xf32>
    %82 = tpu.reciprocal %81 : vector<8x1xf32> -> vector<8x1xf32>
    %83 = vector.broadcast %82 : vector<8x1xf32> to vector<8x8xf32>
    %84 = arith.mulf %79, %83 : vector<8x8xf32>
    %85 = vector.extract_strided_slice %44 {offsets = [0, 8], sizes = [8, 8], strides = [1, 1]} : vector<8x32xf32> to vector<8x8xf32>
    %cst_31 = arith.constant dense<0.000000e+00> : vector<8x8xf32>
    %86 = tpu.matmul %84, %85, %cst_31 {dimension_numbers = #tpu.dot_dimension_numbers<[1], [0], [0], [1], [0, 0, 1, 1], [], []>} : vector<8x8xf32>, vector<8x8xf32>, vector<8x8xf32> -> vector<8x8xf32>
    %87 = vector.extract_strided_slice %42 {offsets = [0, 16], sizes = [8, 8], strides = [1, 1]} : vector<8x32xf32> to vector<8x8xf32>
    %88 = vector.extract_strided_slice %43 {offsets = [0, 16], sizes = [8, 8], strides = [1, 1]} : vector<8x32xf32> to vector<8x8xf32>
    %89 = tpu.transpose %88, [1, 0] : vector<8x8xf32> -> vector<8x8xf32>
    %cst_32 = arith.constant dense<0.000000e+00> : vector<8x8xf32>
    %90 = tpu.matmul %87, %89, %cst_32 {dimension_numbers = #tpu.dot_dimension_numbers<[1], [0], [0], [1], [0, 0, 1, 1], [], []>} : vector<8x8xf32>, vector<8x8xf32>, vector<8x8xf32> -> vector<8x8xf32>
    %cst_33 = arith.constant 0.353553385 : f32
    %91 = vector.broadcast %cst_33 : f32 to vector<8x8xf32>
    %92 = arith.mulf %90, %91 : vector<8x8xf32>
    %93 = vector.broadcast %46 : vector<1x8xf32> to vector<8x8xf32>
    %94 = arith.addf %92, %93 : vector<8x8xf32>
    %cst_34 = arith.constant dense<0xFF800000> : vector<8xf32>
    %95 = vector.multi_reduction <maximumf>, %94, %cst_34 [1] : vector<8x8xf32> to vector<8xf32>
    %96 = vector.shape_cast %95 : vector<8xf32> to vector<8x1xf32>
    %97 = vector.broadcast %96 : vector<8x1xf32> to vector<8x8xf32>
    %98 = arith.subf %94, %97 : vector<8x8xf32>
    %99 = math.exp %98 : vector<8x8xf32>
    %cst_35 = arith.constant dense<0.000000e+00> : vector<8xf32>
    %100 = vector.multi_reduction <add>, %99, %cst_35 [1] : vector<8x8xf32> to vector<8xf32>
    %101 = vector.shape_cast %100 : vector<8xf32> to vector<8x1xf32>
    %102 = tpu.reciprocal %101 : vector<8x1xf32> -> vector<8x1xf32>
    %103 = vector.broadcast %102 : vector<8x1xf32> to vector<8x8xf32>
    %104 = arith.mulf %99, %103 : vector<8x8xf32>
    %105 = vector.extract_strided_slice %44 {offsets = [0, 16], sizes = [8, 8], strides = [1, 1]} : vector<8x32xf32> to vector<8x8xf32>
    %cst_36 = arith.constant dense<0.000000e+00> : vector<8x8xf32>
    %106 = tpu.matmul %104, %105, %cst_36 {dimension_numbers = #tpu.dot_dimension_numbers<[1], [0], [0], [1], [0, 0, 1, 1], [], []>} : vector<8x8xf32>, vector<8x8xf32>, vector<8x8xf32> -> vector<8x8xf32>
    %107 = vector.extract_strided_slice %42 {offsets = [0, 24], sizes = [8, 8], strides = [1, 1]} : vector<8x32xf32> to vector<8x8xf32>
    %108 = vector.extract_strided_slice %43 {offsets = [0, 24], sizes = [8, 8], strides = [1, 1]} : vector<8x32xf32> to vector<8x8xf32>
    %109 = tpu.transpose %108, [1, 0] : vector<8x8xf32> -> vector<8x8xf32>
    %cst_37 = arith.constant dense<0.000000e+00> : vector<8x8xf32>
    %110 = tpu.matmul %107, %109, %cst_37 {dimension_numbers = #tpu.dot_dimension_numbers<[1], [0], [0], [1], [0, 0, 1, 1], [], []>} : vector<8x8xf32>, vector<8x8xf32>, vector<8x8xf32> -> vector<8x8xf32>
    %cst_38 = arith.constant 0.353553385 : f32
    %111 = vector.broadcast %cst_38 : f32 to vector<8x8xf32>
    %112 = arith.mulf %110, %111 : vector<8x8xf32>
    %113 = vector.broadcast %46 : vector<1x8xf32> to vector<8x8xf32>
    %114 = arith.addf %112, %113 : vector<8x8xf32>
    %cst_39 = arith.constant dense<0xFF800000> : vector<8xf32>
    %115 = vector.multi_reduction <maximumf>, %114, %cst_39 [1] : vector<8x8xf32> to vector<8xf32>
    %116 = vector.shape_cast %115 : vector<8xf32> to vector<8x1xf32>
    %117 = vector.broadcast %116 : vector<8x1xf32> to vector<8x8xf32>
    %118 = arith.subf %114, %117 : vector<8x8xf32>
    %119 = math.exp %118 : vector<8x8xf32>
    %cst_40 = arith.constant dense<0.000000e+00> : vector<8xf32>
    %120 = vector.multi_reduction <add>, %119, %cst_40 [1] : vector<8x8xf32> to vector<8xf32>
    %121 = vector.shape_cast %120 : vector<8xf32> to vector<8x1xf32>
    %122 = tpu.reciprocal %121 : vector<8x1xf32> -> vector<8x1xf32>
    %123 = vector.broadcast %122 : vector<8x1xf32> to vector<8x8xf32>
    %124 = arith.mulf %119, %123 : vector<8x8xf32>
    %125 = vector.extract_strided_slice %44 {offsets = [0, 24], sizes = [8, 8], strides = [1, 1]} : vector<8x32xf32> to vector<8x8xf32>
    %cst_41 = arith.constant dense<0.000000e+00> : vector<8x8xf32>
    %126 = tpu.matmul %124, %125, %cst_41 {dimension_numbers = #tpu.dot_dimension_numbers<[1], [0], [0], [1], [0, 0, 1, 1], [], []>} : vector<8x8xf32>, vector<8x8xf32>, vector<8x8xf32> -> vector<8x8xf32>
    %127 = tpu.concatenate %66, %86, %106, %126 in 1 : vector<8x8xf32>, vector<8x8xf32>, vector<8x8xf32>, vector<8x8xf32> -> vector<8x32xf32>
    %128 = vector.extract_strided_slice %39 {offsets = [8, 0], sizes = [8, 32], strides = [1, 1]} : vector<16x32xf32> to vector<8x32xf32>
    %129 = vector.extract_strided_slice %40 {offsets = [8, 0], sizes = [8, 32], strides = [1, 1]} : vector<16x32xf32> to vector<8x32xf32>
    %130 = vector.extract_strided_slice %41 {offsets = [8, 0], sizes = [8, 32], strides = [1, 1]} : vector<16x32xf32> to vector<8x32xf32>
    %131 = vector.extract_strided_slice %4 {offsets = [1, 0, 0], sizes = [1, 1, 8], strides = [1, 1, 1]} : vector<2x1x8xf32> to vector<1x1x8xf32>
    %132 = vector.shape_cast %131 : vector<1x1x8xf32> to vector<1x8xf32>
    %133 = vector.extract_strided_slice %128 {offsets = [0, 0], sizes = [8, 8], strides = [1, 1]} : vector<8x32xf32> to vector<8x8xf32>
    %134 = vector.extract_strided_slice %129 {offsets = [0, 0], sizes = [8, 8], strides = [1, 1]} : vector<8x32xf32> to vector<8x8xf32>
    %135 = tpu.transpose %134, [1, 0] : vector<8x8xf32> -> vector<8x8xf32>
    %cst_42 = arith.constant dense<0.000000e+00> : vector<8x8xf32>
    %136 = tpu.matmul %133, %135, %cst_42 {dimension_numbers = #tpu.dot_dimension_numbers<[1], [0], [0], [1], [0, 0, 1, 1], [], []>} : vector<8x8xf32>, vector<8x8xf32>, vector<8x8xf32> -> vector<8x8xf32>
    %cst_43 = arith.constant 0.353553385 : f32
    %137 = vector.broadcast %cst_43 : f32 to vector<8x8xf32>
    %138 = arith.mulf %136, %137 : vector<8x8xf32>
    %139 = vector.broadcast %132 : vector<1x8xf32> to vector<8x8xf32>
    %140 = arith.addf %138, %139 : vector<8x8xf32>
    %cst_44 = arith.constant dense<0xFF800000> : vector<8xf32>
    %141 = vector.multi_reduction <maximumf>, %140, %cst_44 [1] : vector<8x8xf32> to vector<8xf32>
    %142 = vector.shape_cast %141 : vector<8xf32> to vector<8x1xf32>
    %143 = vector.broadcast %142 : vector<8x1xf32> to vector<8x8xf32>
    %144 = arith.subf %140, %143 : vector<8x8xf32>
    %145 = math.exp %144 : vector<8x8xf32>
    %cst_45 = arith.constant dense<0.000000e+00> : vector<8xf32>
    %146 = vector.multi_reduction <add>, %145, %cst_45 [1] : vector<8x8xf32> to vector<8xf32>
    %147 = vector.shape_cast %146 : vector<8xf32> to vector<8x1xf32>
    %148 = tpu.reciprocal %147 : vector<8x1xf32> -> vector<8x1xf32>
    %149 = vector.broadcast %148 : vector<8x1xf32> to vector<8x8xf32>
    %150 = arith.mulf %145, %149 : vector<8x8xf32>
    %151 = vector.extract_strided_slice %130 {offsets = [0, 0], sizes = [8, 8], strides = [1, 1]} : vector<8x32xf32> to vector<8x8xf32>
    %cst_46 = arith.constant dense<0.000000e+00> : vector<8x8xf32>
    %152 = tpu.matmul %150, %151, %cst_46 {dimension_numbers = #tpu.dot_dimension_numbers<[1], [0], [0], [1], [0, 0, 1, 1], [], []>} : vector<8x8xf32>, vector<8x8xf32>, vector<8x8xf32> -> vector<8x8xf32>
    %153 = vector.extract_strided_slice %128 {offsets = [0, 8], sizes = [8, 8], strides = [1, 1]} : vector<8x32xf32> to vector<8x8xf32>
    %154 = vector.extract_strided_slice %129 {offsets = [0, 8], sizes = [8, 8], strides = [1, 1]} : vector<8x32xf32> to vector<8x8xf32>
    %155 = tpu.transpose %154, [1, 0] : vector<8x8xf32> -> vector<8x8xf32>
    %cst_47 = arith.constant dense<0.000000e+00> : vector<8x8xf32>
    %156 = tpu.matmul %153, %155, %cst_47 {dimension_numbers = #tpu.dot_dimension_numbers<[1], [0], [0], [1], [0, 0, 1, 1], [], []>} : vector<8x8xf32>, vector<8x8xf32>, vector<8x8xf32> -> vector<8x8xf32>
    %cst_48 = arith.constant 0.353553385 : f32
    %157 = vector.broadcast %cst_48 : f32 to vector<8x8xf32>
    %158 = arith.mulf %156, %157 : vector<8x8xf32>
    %159 = vector.broadcast %132 : vector<1x8xf32> to vector<8x8xf32>
    %160 = arith.addf %158, %159 : vector<8x8xf32>
    %cst_49 = arith.constant dense<0xFF800000> : vector<8xf32>
    %161 = vector.multi_reduction <maximumf>, %160, %cst_49 [1] : vector<8x8xf32> to vector<8xf32>
    %162 = vector.shape_cast %161 : vector<8xf32> to vector<8x1xf32>
    %163 = vector.broadcast %162 : vector<8x1xf32> to vector<8x8xf32>
    %164 = arith.subf %160, %163 : vector<8x8xf32>
    %165 = math.exp %164 : vector<8x8xf32>
    %cst_50 = arith.constant dense<0.000000e+00> : vector<8xf32>
    %166 = vector.multi_reduction <add>, %165, %cst_50 [1] : vector<8x8xf32> to vector<8xf32>
    %167 = vector.shape_cast %166 : vector<8xf32> to vector<8x1xf32>
    %168 = tpu.reciprocal %167 : vector<8x1xf32> -> vector<8x1xf32>
    %169 = vector.broadcast %168 : vector<8x1xf32> to vector<8x8xf32>
    %170 = arith.mulf %165, %169 : vector<8x8xf32>
    %171 = vector.extract_strided_slice %130 {offsets = [0, 8], sizes = [8, 8], strides = [1, 1]} : vector<8x32xf32> to vector<8x8xf32>
    %cst_51 = arith.constant dense<0.000000e+00> : vector<8x8xf32>
    %172 = tpu.matmul %170, %171, %cst_51 {dimension_numbers = #tpu.dot_dimension_numbers<[1], [0], [0], [1], [0, 0, 1, 1], [], []>} : vector<8x8xf32>, vector<8x8xf32>, vector<8x8xf32> -> vector<8x8xf32>
    %173 = vector.extract_strided_slice %128 {offsets = [0, 16], sizes = [8, 8], strides = [1, 1]} : vector<8x32xf32> to vector<8x8xf32>
    %174 = vector.extract_strided_slice %129 {offsets = [0, 16], sizes = [8, 8], strides = [1, 1]} : vector<8x32xf32> to vector<8x8xf32>
    %175 = tpu.transpose %174, [1, 0] : vector<8x8xf32> -> vector<8x8xf32>
    %cst_52 = arith.constant dense<0.000000e+00> : vector<8x8xf32>
    %176 = tpu.matmul %173, %175, %cst_52 {dimension_numbers = #tpu.dot_dimension_numbers<[1], [0], [0], [1], [0, 0, 1, 1], [], []>} : vector<8x8xf32>, vector<8x8xf32>, vector<8x8xf32> -> vector<8x8xf32>
    %cst_53 = arith.constant 0.353553385 : f32
    %177 = vector.broadcast %cst_53 : f32 to vector<8x8xf32>
    %178 = arith.mulf %176, %177 : vector<8x8xf32>
    %179 = vector.broadcast %132 : vector<1x8xf32> to vector<8x8xf32>
    %180 = arith.addf %178, %179 : vector<8x8xf32>
    %cst_54 = arith.constant dense<0xFF800000> : vector<8xf32>
    %181 = vector.multi_reduction <maximumf>, %180, %cst_54 [1] : vector<8x8xf32> to vector<8xf32>
    %182 = vector.shape_cast %181 : vector<8xf32> to vector<8x1xf32>
    %183 = vector.broadcast %182 : vector<8x1xf32> to vector<8x8xf32>
    %184 = arith.subf %180, %183 : vector<8x8xf32>
    %185 = math.exp %184 : vector<8x8xf32>
    %cst_55 = arith.constant dense<0.000000e+00> : vector<8xf32>
    %186 = vector.multi_reduction <add>, %185, %cst_55 [1] : vector<8x8xf32> to vector<8xf32>
    %187 = vector.shape_cast %186 : vector<8xf32> to vector<8x1xf32>
    %188 = tpu.reciprocal %187 : vector<8x1xf32> -> vector<8x1xf32>
    %189 = vector.broadcast %188 : vector<8x1xf32> to vector<8x8xf32>
    %190 = arith.mulf %185, %189 : vector<8x8xf32>
    %191 = vector.extract_strided_slice %130 {offsets = [0, 16], sizes = [8, 8], strides = [1, 1]} : vector<8x32xf32> to vector<8x8xf32>
    %cst_56 = arith.constant dense<0.000000e+00> : vector<8x8xf32>
    %192 = tpu.matmul %190, %191, %cst_56 {dimension_numbers = #tpu.dot_dimension_numbers<[1], [0], [0], [1], [0, 0, 1, 1], [], []>} : vector<8x8xf32>, vector<8x8xf32>, vector<8x8xf32> -> vector<8x8xf32>
    %193 = vector.extract_strided_slice %128 {offsets = [0, 24], sizes = [8, 8], strides = [1, 1]} : vector<8x32xf32> to vector<8x8xf32>
    %194 = vector.extract_strided_slice %129 {offsets = [0, 24], sizes = [8, 8], strides = [1, 1]} : vector<8x32xf32> to vector<8x8xf32>
    %195 = tpu.transpose %194, [1, 0] : vector<8x8xf32> -> vector<8x8xf32>
    %cst_57 = arith.constant dense<0.000000e+00> : vector<8x8xf32>
    %196 = tpu.matmul %193, %195, %cst_57 {dimension_numbers = #tpu.dot_dimension_numbers<[1], [0], [0], [1], [0, 0, 1, 1], [], []>} : vector<8x8xf32>, vector<8x8xf32>, vector<8x8xf32> -> vector<8x8xf32>
    %cst_58 = arith.constant 0.353553385 : f32
    %197 = vector.broadcast %cst_58 : f32 to vector<8x8xf32>
    %198 = arith.mulf %196, %197 : vector<8x8xf32>
    %199 = vector.broadcast %132 : vector<1x8xf32> to vector<8x8xf32>
    %200 = arith.addf %198, %199 : vector<8x8xf32>
    %cst_59 = arith.constant dense<0xFF800000> : vector<8xf32>
    %201 = vector.multi_reduction <maximumf>, %200, %cst_59 [1] : vector<8x8xf32> to vector<8xf32>
    %202 = vector.shape_cast %201 : vector<8xf32> to vector<8x1xf32>
    %203 = vector.broadcast %202 : vector<8x1xf32> to vector<8x8xf32>
    %204 = arith.subf %200, %203 : vector<8x8xf32>
    %205 = math.exp %204 : vector<8x8xf32>
    %cst_60 = arith.constant dense<0.000000e+00> : vector<8xf32>
    %206 = vector.multi_reduction <add>, %205, %cst_60 [1] : vector<8x8xf32> to vector<8xf32>
    %207 = vector.shape_cast %206 : vector<8xf32> to vector<8x1xf32>
    %208 = tpu.reciprocal %207 : vector<8x1xf32> -> vector<8x1xf32>
    %209 = vector.broadcast %208 : vector<8x1xf32> to vector<8x8xf32>
    %210 = arith.mulf %205, %209 : vector<8x8xf32>
    %211 = vector.extract_strided_slice %130 {offsets = [0, 24], sizes = [8, 8], strides = [1, 1]} : vector<8x32xf32> to vector<8x8xf32>
    %cst_61 = arith.constant dense<0.000000e+00> : vector<8x8xf32>
    %212 = tpu.matmul %210, %211, %cst_61 {dimension_numbers = #tpu.dot_dimension_numbers<[1], [0], [0], [1], [0, 0, 1, 1], [], []>} : vector<8x8xf32>, vector<8x8xf32>, vector<8x8xf32> -> vector<8x8xf32>
    %213 = tpu.concatenate %152, %172, %192, %212 in 1 : vector<8x8xf32>, vector<8x8xf32>, vector<8x8xf32>, vector<8x8xf32> -> vector<8x32xf32>
    %214 = tpu.concatenate %127, %213 in 0 : vector<8x32xf32>, vector<8x32xf32> -> vector<16x32xf32>
    %c0_62 = arith.constant 0 : index
    %c0_63 = arith.constant 0 : index
    %c0_64 = arith.constant 0 : index
    %215 = vector.load %arg7[%c0_62, %c0_63, %c0_64] : memref<1x32x32xf32, #tpu.memory_space<vmem>>, vector<1x32x32xf32>
    %216 = vector.shape_cast %215 : vector<1x32x32xf32> to vector<32x32xf32>
    %cst_65 = arith.constant dense<0.000000e+00> : vector<16x32xf32>
    %217 = tpu.matmul %214, %216, %cst_65 {dimension_numbers = #tpu.dot_dimension_numbers<[1], [0], [0], [1], [0, 0, 1, 1], [], []>} : vector<16x32xf32>, vector<32x32xf32>, vector<16x32xf32> -> vector<16x32xf32>
    %c0_66 = arith.constant 0 : index
    %c0_67 = arith.constant 0 : index
    %c0_68 = arith.constant 0 : index
    %218 = vector.load %arg8[%c0_66, %c0_67, %c0_68] : memref<1x1x32xf32, #tpu.memory_space<vmem>>, vector<1x1x32xf32>
    %219 = vector.shape_cast %218 : vector<1x1x32xf32> to vector<1x32xf32>
    %220 = vector.broadcast %219 : vector<1x32xf32> to vector<16x32xf32>
    %221 = arith.addf %217, %220 : vector<16x32xf32>
    %222 = arith.addf %3, %221 : vector<16x32xf32>
    %c0_69 = arith.constant 0 : index
    %c0_70 = arith.constant 0 : index
    %c0_71 = arith.constant 0 : index
    %223 = vector.load %arg9[%c0_69, %c0_70, %c0_71] : memref<1x1x32xf32, #tpu.memory_space<vmem>>, vector<1x1x32xf32>
    %224 = vector.shape_cast %223 : vector<1x1x32xf32> to vector<1x32xf32>
    %c0_72 = arith.constant 0 : index
    %c0_73 = arith.constant 0 : index
    %c0_74 = arith.constant 0 : index
    %225 = vector.load %arg10[%c0_72, %c0_73, %c0_74] : memref<1x1x32xf32, #tpu.memory_space<vmem>>, vector<1x1x32xf32>
    %226 = vector.shape_cast %225 : vector<1x1x32xf32> to vector<1x32xf32>
    %cst_75 = arith.constant dense<0.000000e+00> : vector<16xf32>
    %227 = vector.multi_reduction <add>, %222, %cst_75 [1] : vector<16x32xf32> to vector<16xf32>
    %228 = vector.shape_cast %227 : vector<16xf32> to vector<16x1xf32>
    %cst_76 = arith.constant 3.200000e+01 : f32
    %229 = vector.broadcast %cst_76 : f32 to vector<16x1xf32>
    %230 = arith.divf %228, %229 : vector<16x1xf32>
    %231 = vector.broadcast %230 : vector<16x1xf32> to vector<16x32xf32>
    %232 = arith.subf %222, %231 : vector<16x32xf32>
    %233 = arith.mulf %232, %232 : vector<16x32xf32>
    %cst_77 = arith.constant dense<0.000000e+00> : vector<16xf32>
    %234 = vector.multi_reduction <add>, %233, %cst_77 [1] : vector<16x32xf32> to vector<16xf32>
    %235 = vector.shape_cast %234 : vector<16xf32> to vector<16x1xf32>
    %cst_78 = arith.constant 0.0322580636 : f32
    %236 = vector.broadcast %cst_78 : f32 to vector<16x1xf32>
    %237 = arith.mulf %235, %236 : vector<16x1xf32>
    %238 = math.sqrt %237 : vector<16x1xf32>
    %cst_79 = arith.constant 9.99999997E-7 : f32
    %239 = vector.broadcast %cst_79 : f32 to vector<16x1xf32>
    %240 = arith.addf %238, %239 : vector<16x1xf32>
    %241 = tpu.reciprocal %240 : vector<16x1xf32> -> vector<16x1xf32>
    %242 = vector.broadcast %230 : vector<16x1xf32> to vector<16x32xf32>
    %243 = arith.subf %222, %242 : vector<16x32xf32>
    %244 = vector.broadcast %224 : vector<1x32xf32> to vector<16x32xf32>
    %245 = arith.mulf %244, %243 : vector<16x32xf32>
    %246 = vector.broadcast %241 : vector<16x1xf32> to vector<16x32xf32>
    %247 = arith.mulf %245, %246 : vector<16x32xf32>
    %248 = vector.broadcast %226 : vector<1x32xf32> to vector<16x32xf32>
    %249 = arith.addf %247, %248 : vector<16x32xf32>
    %c0_80 = arith.constant 0 : index
    %c0_81 = arith.constant 0 : index
    %c0_82 = arith.constant 0 : index
    %250 = vector.load %arg11[%c0_80, %c0_81, %c0_82] : memref<1x32x64xf32, #tpu.memory_space<vmem>>, vector<1x32x64xf32>
    %251 = vector.shape_cast %250 : vector<1x32x64xf32> to vector<32x64xf32>
    %cst_83 = arith.constant dense<0.000000e+00> : vector<16x64xf32>
    %252 = tpu.matmul %249, %251, %cst_83 {dimension_numbers = #tpu.dot_dimension_numbers<[1], [0], [0], [1], [0, 0, 1, 1], [], []>} : vector<16x32xf32>, vector<32x64xf32>, vector<16x64xf32> -> vector<16x64xf32>
    %c0_84 = arith.constant 0 : index
    %c0_85 = arith.constant 0 : index
    %c0_86 = arith.constant 0 : index
    %253 = vector.load %arg12[%c0_84, %c0_85, %c0_86] : memref<1x1x64xf32, #tpu.memory_space<vmem>>, vector<1x1x64xf32>
    %254 = vector.shape_cast %253 : vector<1x1x64xf32> to vector<1x64xf32>
    %255 = vector.broadcast %254 : vector<1x64xf32> to vector<16x64xf32>
    %256 = arith.addf %252, %255 : vector<16x64xf32>
    %cst_87 = arith.constant 0.000000e+00 : f32
    %257 = vector.broadcast %cst_87 : f32 to vector<16x64xf32>
    %258 = arith.maximumf %256, %257 : vector<16x64xf32>
    %c0_88 = arith.constant 0 : index
    %c0_89 = arith.constant 0 : index
    %c0_90 = arith.constant 0 : index
    %259 = vector.load %arg13[%c0_88, %c0_89, %c0_90] : memref<1x64x32xf32, #tpu.memory_space<vmem>>, vector<1x64x32xf32>
    %260 = vector.shape_cast %259 : vector<1x64x32xf32> to vector<64x32xf32>
    %cst_91 = arith.constant dense<0.000000e+00> : vector<16x32xf32>
    %261 = tpu.matmul %258, %260, %cst_91 {dimension_numbers = #tpu.dot_dimension_numbers<[1], [0], [0], [1], [0, 0, 1, 1], [], []>} : vector<16x64xf32>, vector<64x32xf32>, vector<16x32xf32> -> vector<16x32xf32>
    %c0_92 = arith.constant 0 : index
    %c0_93 = arith.constant 0 : index
    %c0_94 = arith.constant 0 : index
    %262 = vector.load %arg14[%c0_92, %c0_93, %c0_94] : memref<1x1x32xf32, #tpu.memory_space<vmem>>, vector<1x1x32xf32>
    %263 = vector.shape_cast %262 : vector<1x1x32xf32> to vector<1x32xf32>
    %264 = vector.broadcast %263 : vector<1x32xf32> to vector<16x32xf32>
    %265 = arith.addf %261, %264 : vector<16x32xf32>
    %266 = arith.addf %222, %265 : vector<16x32xf32>
    %c0_95 = arith.constant 0 : index
    %c0_96 = arith.constant 0 : index
    %267 = vector.load %arg16[%c0_95, %c0_96] : memref<16x32xf32, #tpu.memory_space<vmem>>, vector<16x32xf32>
    tpu.vector_store %arg16[%c0_95, %c0_96], %266 {strides = array<i32>} : memref<16x32xf32, #tpu.memory_space<vmem>>, vector<16x32xf32>,
    %c1_i32 = arith.constant 1 : i32
    %268 = arith.cmpi eq, %arg0, %c1_i32 : i32
    %269 = arith.extui %268 : i1 to i32
    %c0_i32_97 = arith.constant 0 : i32
    %270 = arith.cmpi ne, %269, %c0_i32_97 : i32
    scf.if %270 {
      %c0_98 = arith.constant 0 : index
      %c0_99 = arith.constant 0 : index
      %271 = vector.load %arg15[%c0_98, %c0_99] : memref<16x32xf32, #tpu.memory_space<vmem>>, vector<16x32xf32>
      tpu.vector_store %arg15[%c0_98, %c0_99], %266 {strides = array<i32>} : memref<16x32xf32, #tpu.memory_space<vmem>>, vector<16x32xf32>,
    } else {
    }
    return
  }
  func.func @transform_0(%arg0: i32) -> (i32, i32) {
    %c0_i32 = arith.constant 0 : i32
    %c0_i32_0 = arith.constant 0 : i32
    %c0_i32_1 = arith.constant 0 : i32
    return %c0_i32, %c0_i32_0 : i32, i32
  }
  func.func @transform_1(%arg0: i32) -> (i32, i32, i32) {
    %c0_i32 = arith.constant 0 : i32
    %c0_i32_0 = arith.constant 0 : i32
    %c0_i32_1 = arith.constant 0 : i32
    %c0_i32_2 = arith.constant 0 : i32
    return %c0_i32, %c0_i32_0, %c0_i32_1 : i32, i32, i32
  }
  func.func @transform_2(%arg0: i32) -> (i32, i32, i32) {
    %c0_i32 = arith.constant 0 : i32
    %c0_i32_0 = arith.constant 0 : i32
    %c0_i32_1 = arith.constant 0 : i32
    return %arg0, %c0_i32, %c0_i32_0 : i32, i32, i32
  }
  func.func @transform_3(%arg0: i32) -> (i32, i32, i32) {
    %c0_i32 = arith.constant 0 : i32
    %c0_i32_0 = arith.constant 0 : i32
    %c0_i32_1 = arith.constant 0 : i32
    return %arg0, %c0_i32, %c0_i32_0 : i32, i32, i32
  }
  func.func @transform_4(%arg0: i32) -> (i32, i32, i32) {
    %c0_i32 = arith.constant 0 : i32
    %c0_i32_0 = arith.constant 0 : i32
    %c0_i32_1 = arith.constant 0 : i32
    return %arg0, %c0_i32, %c0_i32_0 : i32, i32, i32
  }
  func.func @transform_5(%arg0: i32) -> (i32, i32, i32) {
    %c0_i32 = arith.constant 0 : i32
    %c0_i32_0 = arith.constant 0 : i32
    %c0_i32_1 = arith.constant 0 : i32
    return %arg0, %c0_i32, %c0_i32_0 : i32, i32, i32
  }
  func.func @transform_6(%arg0: i32) -> (i32, i32, i32) {
    %c0_i32 = arith.constant 0 : i32
    %c0_i32_0 = arith.constant 0 : i32
    %c0_i32_1 = arith.constant 0 : i32
    return %arg0, %c0_i32, %c0_i32_0 : i32, i32, i32
  }
  func.func @transform_7(%arg0: i32) -> (i32, i32, i32) {
    %c0_i32 = arith.constant 0 : i32
    %c0_i32_0 = arith.constant 0 : i32
    %c0_i32_1 = arith.constant 0 : i32
    return %arg0, %c0_i32, %c0_i32_0 : i32, i32, i32
  }
  func.func @transform_8(%arg0: i32) -> (i32, i32, i32) {
    %c0_i32 = arith.constant 0 : i32
    %c0_i32_0 = arith.constant 0 : i32
    %c0_i32_1 = arith.constant 0 : i32
    return %arg0, %c0_i32, %c0_i32_0 : i32, i32, i32
  }
  func.func @transform_9(%arg0: i32) -> (i32, i32, i32) {
    %c0_i32 = arith.constant 0 : i32
    %c0_i32_0 = arith.constant 0 : i32
    %c0_i32_1 = arith.constant 0 : i32
    return %arg0, %c0_i32, %c0_i32_0 : i32, i32, i32
  }
  func.func @transform_10(%arg0: i32) -> (i32, i32, i32) {
    %c0_i32 = arith.constant 0 : i32
    %c0_i32_0 = arith.constant 0 : i32
    %c0_i32_1 = arith.constant 0 : i32
    return %arg0, %c0_i32, %c0_i32_0 : i32, i32, i32
  }
  func.func @transform_11(%arg0: i32) -> (i32, i32, i32) {
    %c0_i32 = arith.constant 0 : i32
    %c0_i32_0 = arith.constant 0 : i32
    %c0_i32_1 = arith.constant 0 : i32
    return %arg0, %c0_i32, %c0_i32_0 : i32, i32, i32
  }
  func.func @transform_12(%arg0: i32) -> (i32, i32, i32) {
    %c0_i32 = arith.constant 0 : i32
    %c0_i32_0 = arith.constant 0 : i32
    %c0_i32_1 = arith.constant 0 : i32
    return %arg0, %c0_i32, %c0_i32_0 : i32, i32, i32
  }
  func.func @transform_13(%arg0: i32) -> (i32, i32, i32) {
    %c0_i32 = arith.constant 0 : i32
    %c0_i32_0 = arith.constant 0 : i32
    %c0_i32_1 = arith.constant 0 : i32
    return %arg0, %c0_i32, %c0_i32_0 : i32, i32, i32
  }
  func.func @transform_14(%arg0: i32) -> (i32, i32) {
    %c0_i32 = arith.constant 0 : i32
    %c0_i32_0 = arith.constant 0 : i32
    %c0_i32_1 = arith.constant 0 : i32
    return %c0_i32, %c0_i32_0 : i32, i32
  }
}

</mosaic_0001>

<bundles_post_ra>
// kernel: encoder.1
= control target key start
LH: loop header
LB: loop body
LE: loop exit
PB: predicated region body
PF: predicated region fallthrough
CT: control target
= control target key end

     0   :  { %s3541_s0 = inlined_call_operand.vmem [shape: f32[16,32], index: 0, kind: input, shape index: {}]   ;;  %s3542_s1 = inlined_call_operand.vmem [shape: f32[2,1,8], index: 1, kind: input, shape index: {}]   ;;  %s3543_s2 = inlined_call_operand.vmem [shape: f32[2,1,32], index: 2, kind: input, shape index: {}]   ;;  %s3544_s3 = inlined_call_operand.vmem [shape: f32[2,1,32], index: 3, kind: input, shape index: {}]   ;;  %s3545_s4 = inlined_call_operand.vmem [shape: f32[2,32,96], index: 4, kind: input, shape index: {}]   ;;  %s3546_s5 = inlined_call_operand.vmem [shape: f32[2,1,96], index: 5, kind: input, shape index: {}]   ;;  %s3547_s6 = inlined_call_operand.vmem [shape: f32[2,32,32], index: 6, kind: input, shape index: {}]   ;;  %s3548_s7 = inlined_call_operand.vmem [shape: f32[2,1,32], index: 7, kind: input, shape index: {}]   ;;  %s3549_s8 = inlined_call_operand.vmem [shape: f32[2,1,32], index: 8, kind: input, shape index: {}]   ;;  %s3550_s9 = inlined_call_operand.vmem [shape: f32[2,1,32], index: 9, kind: input, shape index: {}]   ;;  %s3551_s10 = inlined_call_operand.vmem [shape: f32[2,32,64], index: 10, kind: input, shape index: {}]   ;;  %s3552_s11 = inlined_call_operand.vmem [shape: f32[2,1,64], index: 11, kind: input, shape index: {}]   ;;  %s3553_s12 = inlined_call_operand.vmem [shape: f32[2,64,32], index: 12, kind: input, shape index: {}]   ;;  %s3554_s13 = inlined_call_operand.vmem [shape: f32[2,1,32], index: 13, kind: input, shape index: {}]   ;;  %s3555_s14 = inlined_call_operand.hbm [shape: f32[16,32], index: 14, kind: output, shape index: {}]  }
   0x1   :  { %3560 = sst [smem:[#allocation8_spill]] %s3542_s1 }
   0x2   :  { %3561 = sst [smem:[#allocation9_spill]] %s3545_s4 }
   0x3   :  { %3562 = sst [smem:[#allocation10_spill]] %s3547_s6 }
   0x4   :  { %3563 = sst [smem:[#allocation11_spill]] %s3555_s14 }
   0x5   :  { %19 = vsyncpa [#allocation4], 0  ;;  %s3186_s29 = smov 0  }
   0x6 LB: > { %3564 = sst [smem:[#allocation6_spill]] %s3091_s29  ;;  %s3192_s30 = sadd.s32 4294967295, %s3091_s29   ;;  %s3091_s29 = sphi %s3186_s29, %s25_s29  }
   0x7   : > { %p2682_p0 = scmp.ge.s32.totalorder %s3091_s29, 1  ;;  %p502_p1 = scmp.lt.s32.totalorder %s3091_s29, 3 }
   0x9   : > { %p503_p2 = pnand %p2682_p0, %p502_p1 }
   0xb   : > { %506 = sbr.rel (%p503_p2) target bundleno = 2639 (0xa4f), region = 76 }
  0x12   : > { %p582_p3 = scmp.lt.s32.totalorder %s3192_s30, 1  ;;  %s3565_s4 = sld [smem:[#allocation9_spill]] }
  0x13   : > { %s3566_s6 = sld [smem:[#allocation10_spill]]  ;;  %p2691_p4 = scmp.ne.s32.totalorder %s3192_s30, 0 }
  0x14   : > { %s3198_s15 = scalar_select %p582_p3, %s3192_s30, 1 }
  0x15   : > { %629 = sbr.rel (%p2691_p4) target bundleno = 28 (0x1c), region = 80  ;;  %v630_v0 = vld [vmem:[%s3541_s0] sm:$0xff] (!%p2691_p4)  ;;  %vm632_vm0 = vcmask (!%p2691_p4), 261120   ;;  %v631_v1 = vld [vmem:[%s3541_s0 + $0x8] sm:$0xff] (!%p2691_p4) }
  0x16   : > { %s2739_s22 = sshll.u32 %s3198_s15, 5  ;;  %s606_s1 = scalar_lea.vmem %s3549_s8, %s3198_s15  ;;  %633 = vst.msk [vmem:[#allocation2] sm:$0xff] (!%p2691_p4), %vm632_vm0, %v630_v0  ;;  %634 = vst.msk [vmem:[#allocation2 + $0x8] sm:$0xff] (!%p2691_p4), %vm632_vm0, %v631_v1 }
  0x17   : > { %s609_s25 = scalar_lea.vmem %s3550_s9, %s3198_s15  ;;  %s625_s23 = scalar_lea.vmem %s3554_s13, %s3198_s15 }
  0x18   : > { %s3216_s28 = scalar_lea.vmem %s3565_s4, %s2739_s22  ;;  %s3238_s4 = scalar_lea.vmem %s3551_s10, %s2739_s22 }
  0x19   : > { %s3221_s29 = scalar_lea.vmem %s3566_s6, %s2739_s22  ;;  %s617_s6 = scalar_lea.vmem %s3552_s11, %s3198_s15 }
  0x1a   : > { %3567 = sst [smem:[#allocation7_spill]] %s3221_s29  ;;  %s2742_s29 = sshll.u32 %s3198_s15, 6 }
  0x1b   : > { %s3248_s19 = scalar_lea.vmem %s3553_s12, %s2742_s29 }
  0x1c PF: > { %vm641_vm1 = vcmask 261120   ;;  %v699_v16 = vld [vmem:[%s3216_s28] sm:$0xff]  ;;  %v700_v17 = vld [vmem:[%s3216_s28 + $0x8] sm:$0xff]  ;;  %v701_v18 = vld [vmem:[%s3216_s28 + $0x10] sm:$0xff]  ;;  %s3568_s16 = scalar_lea.vmem %s3543_s2, %s3198_s15  ;;  %s3569_s18 = scalar_lea.vmem %s3544_s3, %s3198_s15  ;;  %v3093_v48 = vmov 0.0   ;;  %vm3094_vm6 = vmmov 0  }
  0x1d   : > { %v3261_v2 = vld [vmem:[#allocation2] sm:$0xff]  ;;  %v3263_v3 = vld [vmem:[#allocation2 + $0x8] sm:$0xff]  ;;  %v2935_v19 = vpack.c.bf16 %v700_v17, %v699_v16  ;;  %v702_v20 = vld [vmem:[%s3216_s28 + $0x18] sm:$0xff]  ;;  %2824 = vmatprep.subr.mxu0 %v3093_v48  ;;  %2826 = vmatprep.mubr.msk.f32.mxu0 %vm3094_vm6, %v3093_v48  ;;  %s3570_s24 = scalar_lea.vmem %s3546_s5, %s3198_s15  ;;  %s3095_s22 = smov 88   ;;  %vm794_vm7 = vcmask 64512   ;;  %vm1478_vm8 = vcmask 130048  }
  0x1e   : > { %v642_v4 = vsel %vm641_vm1, %v3261_v2, 0.0  ;;  %v645_v5 = vsel %vm641_vm1, %v3263_v3, 0.0  ;;  %v2939_v21 = vpack.c.bf16 %v702_v20, %v701_v18  ;;  %v2692_v38 = vld [vmem:[%s3568_s16] ss:$0 sm:$0xff]  ;;  %s3096_s26 = smov 96   ;;  %s3097_s27 = smov 120  }
  0x1f   : > { %643 = vadd.xlane.f32.xlu0 %v642_v4  ;;  %2936 = vmatprep.subr.bf16.mxu1 %v2935_v19  ;;  %v2693_v41 = vld [vmem:[%s3569_s18] ss:$0 sm:$0xff]  ;;  %s3098_s29 = smov 112   ;;  %s3099_s28 = smov 80   ;;  %vm1480_vm9 = vcmask 195584   ;;  %vm2431_vm14 = vcmask 523264  }
  0x20   : > { %2938 = vmatpush3.bf16.msra.mxu1 %v2935_v19  ;;  %v2694_v49 = vld [vmem:[%s3570_s24] ss:$0 sm:$0xff]  ;;  %s3100_s16 = smov 104   ;;  %s3101_s17 = smov 72  }
  0x21   : > { %2940 = vmatprep.subr.bf16.mxu1 %v2939_v21  ;;  %s3571_s21 = sld [smem:[#allocation8_spill]]  ;;  %s3108_s14 = smov 24  }
  0x22   : > { %s3573_s24 = scalar_lea.vmem %s3548_s7, %s3198_s15  ;;  %p2734_p5 = scmp.ne.s32.totalorder %s3192_s30, 1 }
  0x23   : > { %646 = vadd.xlane.f32.xlu0 %v645_v5 }
  0x24   : > { %2942 = vmatpush3.bf16.msra.mxu1 %v2939_v21 }
  0x25   : > { %2814 = vmatprep.subr.mxu1 %v3093_v48 }
  0xac   : > { %v644_v6 = vpop.xlane.xlu0 %643 }
  0xad   : > { %v649_v7 = vmul.f32 0.03125, %v644_v6 }
  0xaf   : > { %v651_v8 = vsub.f32 %v3261_v2, %v649_v7  ;;  %v2699_v7 = vld [vmem:[%s3571_s21] ss:$0 sm:$0xff] }
  0xb0   : > { %v647_v9 = vpop.xlane.xlu0 %646 }
  0xb1   : > { %v650_v10 = vmul.f32 0.03125, %v647_v9  ;;  %v653_v11 = vmul.f32 %v651_v8, %v651_v8  ;;  %v687_v39 = vmul.f32 %v2692_v38, %v651_v8 }
  0xb3   : > { %v652_v12 = vsub.f32 %v3263_v3, %v650_v10  ;;  %v655_v13 = vsel %vm641_vm1, %v653_v11, 0.0 }
  0xb4   : > { %656 = vadd.xlane.f32.xlu1 %v655_v13 }
  0xb5   : > { %v654_v14 = vmul.f32 %v652_v12, %v652_v12  ;;  %v688_v43 = vmul.f32 %v2692_v38, %v652_v12 }
  0xb7   : > { %v658_v15 = vsel %vm641_vm1, %v654_v14, 0.0 }
  0xb8   : > { %659 = vadd.xlane.f32.xlu1 %v658_v15 }
 0x141   : > { %v657_v22 = vpop.xlane.xlu1 %656 }
 0x142   : > { %v661_v23 = vmul.f32 0.032258064, %v657_v22 }
 0x144   : > { %3007 = vrsqrt.f32 %v661_v23  ;;  %vm665_vm2 = vcmp.eq.f32.partialorder %v661_v23, inf  ;;  %v668_v28 = vand.u32 2147483648, %v661_v23  ;;  %vm667_vm3 = vcmp.eq.f32.partialorder %v661_v23, 0.0 }
 0x145   : > { %v660_v24 = vpop.xlane.xlu1 %659 }
 0x146   : > { %v662_v25 = vmul.f32 0.032258064, %v660_v24 }
 0x148   : > { %3009 = vrsqrt.f32 %v662_v25  ;;  %vm672_vm4 = vcmp.eq.f32.partialorder %v662_v25, inf  ;;  %v675_v34 = vand.u32 2147483648, %v662_v25  ;;  %vm674_vm5 = vcmp.eq.f32.partialorder %v662_v25, 0.0 }
 0x14e   : > { %v3008_v26 = vpop.eup %3007 }
 0x14f   : > { %v664_v27 = vmul.f32 %v3008_v26, %v661_v23 }
 0x151   : > { %v666_v29 = vsel %vm665_vm2, %v661_v23, %v664_v27  ;;  %v2712_v27 = vld [vmem:[%s3571_s21 + $0x1] ss:$0 sm:$0xff] }
 0x152   : > { %v3010_v30 = vpop.eup %3009  ;;  %v669_v31 = vsel %vm667_vm3, %v668_v28, %v666_v29 }
 0x153   : > { %v671_v32 = vmul.f32 %v3010_v30, %v662_v25  ;;  %v677_v33 = vadd.f32 1e-06, %v669_v31 }
 0x155   : > { %v673_v35 = vsel %vm672_vm4, %v662_v25, %v671_v32  ;;  %3011 = vrcp.f32 %v677_v33 }
 0x156   : > { %v676_v36 = vsel %vm674_vm5, %v675_v34, %v673_v35 }
 0x157   : > { %v678_v37 = vadd.f32 1e-06, %v676_v36 }
 0x159   : > { %3013 = vrcp.f32 %v678_v37 }
 0x15f   : > { %v3012_v40 = vpop.eup %3011 }
 0x160   : > { %v689_v42 = vmul.f32 %v3012_v40, %v687_v39 }
 0x162   : > { %v697_v44 = vadd.f32 %v2693_v41, %v689_v42 }
 0x163   : > { %v3014_v45 = vpop.eup %3013 }
 0x164   : > { %v690_v46 = vmul.f32 %v3014_v45, %v688_v43  ;;  %2811 = vmatprep.mubr.msk.f32.mxu1 %vm641_vm1, %v697_v44 }
 0x166   : > { %v698_v47 = vadd.f32 %v2693_v41, %v690_v46 }
 0x168   : > { %2812 = vmatmul.mubr.msk.f32.vlgmr.msra.gmra.mrb[0].mxu1 %vm641_vm1, %v698_v47 }
 0x169   : > { %2816 = vmatprep.mubr.msk.f32.mxu1 %vm3094_vm6, %v3093_v48 }
 0x23b   : > { %v2813_v50 = vpop.f32.mrb[0].mxu1 }
 0x23c   : > { %v782_v51 = vpop.f32.mrb[1].mxu1  ;;  %v3308_v53 = vadd.f32 %v2813_v50, %v2694_v49 }
 0x23d   : > { %v3300_v52 = vadd.f32 %v2694_v49, %v782_v51 }
 0x23f   : > { %966 = vrot.lane.b32.xlu1 %v3300_v52, %s3095_s22  ;;  %792 = vrot.lane.b32.xlu0 %v3300_v52, %s3096_s26 }
 0x243   : > { %964 = vrot.lane.b32.xlu1 %v3300_v52, %s3097_s27  ;;  %1131 = vrot.lane.b32.xlu0 %v3300_v52, %s3098_s29 }
 0x247   : > { %1133 = vrot.lane.b32.xlu1 %v3300_v52, %s3099_s28  ;;  %1298 = vrot.lane.b32.xlu0 %v3300_v52, %s3100_s16 }
 0x24b   : > { %1300 = vrot.lane.b32.xlu1 %v3300_v52, %s3101_s17  ;;  %1656 = vrot.lane.b32.xlu0 %v3308_v53, %s3095_s22  ;;  %s3102_s22 = smov 64  }
 0x24f   : > { %1483 = vrot.lane.b32.xlu1 %v3308_v53, %s3096_s26  ;;  %1823 = vrot.lane.b32.xlu0 %v3308_v53, %s3099_s28  ;;  %s3103_s26 = smov 48   ;;  %s3572_s28 = sld [smem:[#allocation7_spill]] }
 0x253   : > { %1654 = vrot.lane.b32.xlu1 %v3308_v53, %s3097_s27  ;;  %1990 = vrot.lane.b32.xlu0 %v3308_v53, %s3101_s17  ;;  %s3104_s27 = smov 40   ;;  %s3107_s17 = smov 16  }
 0x257   : > { %1821 = vrot.lane.b32.xlu1 %v3308_v53, %s3098_s29  ;;  %s3105_s29 = smov 56  }
 0x25b   : > { %1988 = vrot.lane.b32.xlu1 %v3308_v53, %s3100_s16  ;;  %s3106_s16 = smov 8  }
 0x2b1   : > { %v967_v54 = vpop.permute.xlu1 %966  ;;  %v793_v55 = vpop.permute.xlu0 %792 }
 0x2b2   : > { %2815 = vmatpush3.xpose.msk.msra.mxu1 %vm794_vm7, %v793_v55  ;;  %2825 = vmatpush3.xpose.msk.msra.mxu0 %vm794_vm7, %v967_v54 }
 0x2b3   : > { %2834 = vmatprep.subr.mxu0 %v3093_v48  ;;  %2819 = vmatprep.subr.mxu1 %v3093_v48 }
 0x2b5   : > { %v965_v56 = vpop.permute.xlu1 %964  ;;  %2817 = vmatmul.mubr.msk.f32.vlgmr.msra.gmra.mrb[2].mxu1 %vm794_vm7, %v3300_v52  ;;  %v1132_v57 = vpop.permute.xlu0 %1131 }
 0x2b6   : > { %2827 = vmatmul.mubr.msk.f32.vlgmr.msra.gmra.mrb[0].mxu0 %vm794_vm7, %v965_v56  ;;  %2821 = vmatprep.mubr.msk.f32.mxu1 %vm3094_vm6, %v3093_v48 }
 0x2b7   : > { %2836 = vmatprep.mubr.msk.f32.mxu0 %vm3094_vm6, %v3093_v48 }
 0x2b9   : > { %v1134_v58 = vpop.permute.xlu1 %1133  ;;  %v1299_v59 = vpop.permute.xlu0 %1298 }
 0x2ba   : > { %2835 = vmatpush3.xpose.msk.msra.mxu0 %vm794_vm7, %v1134_v58 }
 0x2bb   : > { %2844 = vmatprep.subr.mxu0 %v3093_v48 }
 0x2bd   : > { %v1301_v60 = vpop.permute.xlu1 %1300  ;;  %2837 = vmatmul.mubr.msk.f32.vlgmr.msra.gmra.mrb[2].mxu0 %vm794_vm7, %v1132_v57  ;;  %v1657_v61 = vpop.permute.xlu0 %1656 }
 0x2be   : > { %2845 = vmatpush3.xpose.msk.msra.mxu0 %vm794_vm7, %v1301_v60  ;;  %2846 = vmatprep.mubr.msk.f32.mxu0 %vm3094_vm6, %v3093_v48 }
 0x2bf   : > { %2854 = vmatprep.subr.mxu0 %v3093_v48 }
 0x2c1   : > { %v1484_v62 = vpop.permute.xlu1 %1483  ;;  %2847 = vmatmul.mubr.msk.f32.vlgmr.msra.gmra.mrb[4].mxu0 %vm794_vm7, %v1299_v59  ;;  %v1824_v0 = vpop.permute.xlu0 %1823 }
 0x2c2   : > { %2855 = vmatpush3.xpose.msk.msra.mxu0 %vm794_vm7, %v1484_v62  ;;  %2856 = vmatprep.mubr.msk.f32.mxu0 %vm3094_vm6, %v3093_v48 }
 0x2c3   : > { %2864 = vmatprep.subr.mxu0 %v3093_v48 }
 0x2c5   : > { %v1655_v63 = vpop.permute.xlu1 %1654  ;;  %2857 = vmatmul.mubr.msk.f32.vlgmr.msra.gmra.mrb[6].mxu0 %vm794_vm7, %v3308_v53  ;;  %v1991_v4 = vpop.permute.xlu0 %1990 }
 0x2c6   : > { %2865 = vmatpush3.xpose.msk.msra.mxu0 %vm794_vm7, %v1657_v61  ;;  %2866 = vmatprep.mubr.msk.f32.mxu0 %vm3094_vm6, %v3093_v48 }
 0x2c7   : > { %2874 = vmatprep.subr.mxu0 %v3093_v48 }
 0x2c9   : > { %2867 = vmatmul.mubr.msk.f32.vlgmr.msra.gmra.mrb[8].mxu0 %vm794_vm7, %v1655_v63  ;;  %v1822_v1 = vpop.permute.xlu1 %1821 }
 0x2ca   : > { %2875 = vmatpush3.xpose.msk.msra.mxu0 %vm794_vm7, %v1824_v0  ;;  %2876 = vmatprep.mubr.msk.f32.mxu0 %vm3094_vm6, %v3093_v48 }
 0x2cb   : > { %2884 = vmatprep.subr.mxu0 %v3093_v48 }
 0x2cd   : > { %2877 = vmatmul.mubr.msk.f32.vlgmr.msra.gmra.mrb[10].mxu0 %vm794_vm7, %v1822_v1  ;;  %v1989_v5 = vpop.permute.xlu1 %1988 }
 0x2ce   : > { %2885 = vmatpush3.xpose.msk.msra.mxu0 %vm794_vm7, %v1991_v4  ;;  %2886 = vmatprep.mubr.msk.f32.mxu0 %vm3094_vm6, %v3093_v48 }
 0x2d1   : > { %2887 = vmatmul.mubr.msk.f32.vlgmr.msra.gmra.mrb[12].mxu0 %vm794_vm7, %v1989_v5 }
 0x388   : > { %v865_v6 = vpop.f32.mrb[2].mxu1 }
 0x389   : > { %v869_v8 = vmul.f32 0.35355338, %v865_v6  ;;  %v2818_v9 = vpop.f32.mrb[3].mxu1  ;;  %v1038_v10 = vpop.f32.mrb[0].mxu0 }
 0x38a   : > { %v1042_v11 = vmul.f32 0.35355338, %v1038_v10  ;;  %v2828_v12 = vpop.f32.mrb[1].mxu0 }
 0x38b   : > { %v876_v13 = vadd.f32 %v2699_v7, %v869_v8 }
 0x38c   : > { %v1043_v14 = vadd.f32 %v2699_v7, %v1042_v11 }
 0x38d   : > { %v877_v15 = vsel %vm794_vm7, %v876_v13, -inf }
 0x38e   : > { %878 = vmax.xlane.f32.xlu0 %v877_v15  ;;  %v1044_v16 = vsel %vm794_vm7, %v1043_v14, -inf }
 0x38f   : > { %1045 = vmax.xlane.f32.xlu1 %v1044_v16 }
 0x390   : > { %v1205_v17 = vpop.f32.mrb[2].mxu0 }
 0x391   : > { %v1209_v18 = vmul.f32 0.35355338, %v1205_v17  ;;  %v2838_v19 = vpop.f32.mrb[3].mxu0 }
 0x393   : > { %v3362_v20 = vadd.f32 %v2699_v7, %v1209_v18 }
 0x394   : > { %v1372_v21 = vpop.f32.mrb[4].mxu0 }
 0x395   : > { %v1376_v22 = vmul.f32 0.35355338, %v1372_v21  ;;  %v2848_v23 = vpop.f32.mrb[5].mxu0  ;;  %v1211_v24 = vsel %vm794_vm7, %v3362_v20, -inf }
 0x396   : > { %1212 = vmax.xlane.f32.xlu0 %v1211_v24 }
 0x397   : > { %v1377_v25 = vadd.f32 %v2699_v7, %v1376_v22 }
 0x398   : > { %v1555_v26 = vpop.f32.mrb[6].mxu0 }
 0x399   : > { %v1559_v28 = vmul.f32 0.35355338, %v1555_v26  ;;  %v2858_v29 = vpop.f32.mrb[7].mxu0  ;;  %v1378_v30 = vsel %vm794_vm7, %v1377_v25, -inf }
 0x39a   : > { %1379 = vmax.xlane.f32.xlu0 %v1378_v30 }
 0x39b   : > { %v3370_v31 = vadd.f32 %v2712_v27, %v1559_v28 }
 0x39c   : > { %v1728_v32 = vpop.f32.mrb[8].mxu0 }
 0x39d   : > { %v1732_v33 = vmul.f32 0.35355338, %v1728_v32  ;;  %v2868_v34 = vpop.f32.mrb[9].mxu0  ;;  %v1567_v35 = vsel %vm794_vm7, %v3370_v31, -inf }
 0x39e   : > { %1568 = vmax.xlane.f32.xlu0 %v1567_v35 }
 0x39f   : > { %v1733_v36 = vadd.f32 %v2712_v27, %v1732_v33 }
 0x3a0   : > { %v1895_v37 = vpop.f32.mrb[10].mxu0 }
 0x3a1   : > { %v1899_v38 = vmul.f32 0.35355338, %v1895_v37  ;;  %v2878_v39 = vpop.f32.mrb[11].mxu0  ;;  %v1734_v40 = vsel %vm794_vm7, %v1733_v36, -inf }
 0x3a2   : > { %1735 = vmax.xlane.f32.xlu1 %v1734_v40 }
 0x3a3   : > { %v1900_v41 = vadd.f32 %v2712_v27, %v1899_v38 }
 0x3a4   : > { %v2062_v42 = vpop.f32.mrb[12].mxu0 }
 0x3a5   : > { %v2888_v43 = vpop.f32.mrb[13].mxu0  ;;  %v1901_v44 = vsel %vm794_vm7, %v1900_v41, -inf  ;;  %v2066_v45 = vmul.f32 0.35355338, %v2062_v42 }
 0x3a6   : > { %1902 = vmax.xlane.f32.xlu0 %v1901_v44 }
 0x3a7   : > { %v2067_v46 = vadd.f32 %v2712_v27, %v2066_v45 }
 0x3a9   : > { %v2068_v47 = vsel %vm794_vm7, %v2067_v46, -inf }
 0x3b3   : > { %888 = vrot.lane.b32.xlu1 %v3300_v52, %s3102_s22 }
 0x3d7   : > { %2069 = vmax.xlane.f32.xlu1 %v2068_v47 }
 0x3e8   : > { %1222 = vrot.lane.b32.xlu1 %v3300_v52, %s3103_s26 }
 0x3ec   : > { %1389 = vrot.lane.b32.xlu1 %v3300_v52, %s3104_s27 }
 0x3f0   : > { %1578 = vrot.lane.b32.xlu1 %v3308_v53, %s3102_s22 }
 0x41b   : > { %v879_v49 = vpop.xlane.xlu0 %878 }
 0x41c   : > { %v880_v50 = vsub.f32 %v876_v13, %v879_v49  ;;  %v1046_v51 = vpop.xlane.xlu1 %1045 }
 0x41d   : > { %v1047_v54 = vsub.f32 %v1043_v14, %v1046_v51 }
 0x41e   : > { %v881_v55 = vmul.f32 1.442695, %v880_v50 }
 0x41f   : > { %v1048_v56 = vmul.f32 1.442695, %v1047_v54 }
 0x420   : > { %3015 = vpow2.f32 %v881_v55 }
 0x421   : > { %3017 = vpow2.f32 %v1048_v56 }
 0x423   : > { %v1213_v57 = vpop.xlane.xlu0 %1212 }
 0x424   : > { %v1214_v7 = vsub.f32 %v3362_v20, %v1213_v57 }
 0x426   : > { %v1215_v9 = vmul.f32 1.442695, %v1214_v7 }
 0x427   : > { %v1380_v58 = vpop.xlane.xlu0 %1379 }
 0x428   : > { %v1381_v59 = vsub.f32 %v1377_v25, %v1380_v58 }
 0x42a   : > { %v3016_v60 = vpop.eup %3015  ;;  %v1382_v61 = vmul.f32 1.442695, %v1381_v59 }
 0x42b   : > { %v3383_v62 = vpop.eup %3017  ;;  %v883_v63 = vsel %vm794_vm7, %v3016_v60, 0.0  ;;  %v1569_v8 = vpop.xlane.xlu0 %1568 }
 0x42c   : > { %3019 = vpow2.f32 %v1382_v61  ;;  %884 = vadd.xlane.f32.xlu0 %v883_v63  ;;  %v1050_v0 = vsel %vm794_vm7, %v3383_v62, 0.0  ;;  %v1570_v10 = vsub.f32 %v3370_v31, %v1569_v8  ;;  %v2172_v8 = vld [vmem:[%s3572_s28 + $0x10] sm:$0xff] }
 0x42d   : > { %1051 = vadd.xlane.f32.xlu1 %v1050_v0  ;;  %3021 = vpow2.f32 %v1215_v9  ;;  %v2173_v9 = vld [vmem:[%s3572_s28 + $0x18] sm:$0xff] }
 0x42e   : > { %v1571_v12 = vmul.f32 1.442695, %v1570_v10 }
 0x42f   : > { %v1736_v1 = vpop.xlane.xlu1 %1735 }
 0x430   : > { %3023 = vpow2.f32 %v1571_v12  ;;  %v1737_v14 = vsub.f32 %v1733_v36, %v1736_v1 }
 0x432   : > { %v1738_v16 = vmul.f32 1.442695, %v1737_v14 }
 0x433   : > { %v889_v4 = vpop.permute.xlu1 %888  ;;  %v1903_v11 = vpop.xlane.xlu0 %1902 }
 0x434   : > { %2820 = vmatpush3.msra.mxu1 %v889_v4  ;;  %v1904_v13 = vsub.f32 %v1900_v41, %v1903_v11  ;;  %v2170_v4 = vld [vmem:[%s3572_s28] sm:$0xff]  ;;  %v2947_v11 = vpack.c.bf16 %v2173_v9, %v2172_v8 }
 0x435   : > { %2829 = vmatprep.subr.mxu1 %v3093_v48 }
 0x436   : > { %v3389_v5 = vpop.eup %3019  ;;  %v1905_v15 = vmul.f32 1.442695, %v1904_v13 }
 0x437   : > { %v1384_v6 = vsel %vm794_vm7, %v3389_v5, 0.0  ;;  %v3022_v17 = vpop.eup %3021 }
 0x438   : > { %1385 = vadd.xlane.f32.xlu1 %v1384_v6  ;;  %3025 = vpow2.f32 %v1905_v15 }
 0x439   : > { %3027 = vpow2.f32 %v1738_v16 }
 0x43a   : > { %v3024_v18 = vpop.eup %3023 }
 0x43b   : > { %v1573_v20 = vsel %vm794_vm7, %v3024_v18, 0.0 }
 0x442   : > { %1055 = vrot.lane.b32.xlu0 %v3300_v52, %s3105_s29  ;;  %v1217_v52 = vsel %vm794_vm7, %v3022_v17, 0.0  ;;  %v3399_v21 = vpop.eup %3025 }
 0x443   : > { %v1907_v24 = vsel %vm794_vm7, %v3399_v21, 0.0  ;;  %v3028_v25 = vpop.eup %3027 }
 0x444   : > { %v1740_v26 = vsel %vm794_vm7, %v3028_v25, 0.0 }
 0x449   : > { %1745 = vrot.lane.b32.xlu1 %v3308_v53, %s3105_s29 }
 0x461   : > { %1218 = vadd.xlane.f32.xlu0 %v1217_v52 }
 0x464   : > { %v2070_v19 = vpop.xlane.xlu1 %2069 }
 0x465   : > { %v2071_v22 = vsub.f32 %v2067_v46, %v2070_v19  ;;  %1574 = vadd.xlane.f32.xlu0 %v1573_v20 }
 0x467   : > { %v2072_v23 = vmul.f32 1.442695, %v2071_v22 }
 0x468   : > { %v1223_v29 = vpop.permute.xlu1 %1222 }
 0x469   : > { %3029 = vpow2.f32 %v2072_v23  ;;  %1908 = vadd.xlane.f32.xlu0 %v1907_v24 }
 0x46c   : > { %v1390_v30 = vpop.permute.xlu1 %1389 }
 0x46d   : > { %1741 = vadd.xlane.f32.xlu1 %v1740_v26 }
 0x470   : > { %v1579_v31 = vpop.permute.xlu1 %1578 }
 0x473   : > { %v3404_v27 = vpop.eup %3029 }
 0x474   : > { %v2074_v28 = vsel %vm794_vm7, %v3404_v27, 0.0 }
 0x475   : > { %2075 = vadd.xlane.f32.xlu0 %v2074_v28 }
 0x47e   : > { %2079 = vrot.lane.b32.xlu1 %v3308_v53, %s3104_s27 }
 0x48b   : > { %1912 = vrot.lane.b32.xlu0 %v3308_v53, %s3103_s26 }
 0x4b9   : > { %v885_v32 = vpop.xlane.xlu0 %884 }
 0x4ba   : > { %3031 = vrcp.f32 %v885_v32  ;;  %v1052_v33 = vpop.xlane.xlu1 %1051  ;;  %v2723_v32 = vld [vmem:[%s3573_s24] ss:$0 sm:$0xff] }
 0x4bb   : > { %3033 = vrcp.f32 %v1052_v33 }
 0x4bd   : > { %v1056_v37 = vpop.permute.xlu0 %1055 }
 0x4c4   : > { %v3032_v34 = vpop.eup %3031 }
 0x4c5   : > { %v887_v35 = vmul.f32 %v3032_v34, %v3016_v60  ;;  %v3034_v36 = vpop.eup %3033  ;;  %v1386_v53 = vpop.xlane.xlu1 %1385 }
 0x4c6   : > { %v1054_v38 = vmul.f32 %v3034_v36, %v3383_v62 }
 0x4c7   : > { %2822 = vmatmul.mubr.msk.f32.vlgmr.msra.gmra.mrb[4].mxu1 %vm794_vm7, %v887_v35 }
 0x4c8   : > { %2830 = vmatpush3.msra.mxu1 %v1056_v37  ;;  %2831 = vmatprep.mubr.msk.f32.mxu1 %vm3094_vm6, %v3093_v48 }
 0x4c9   : > { %2839 = vmatprep.subr.mxu1 %v3093_v48  ;;  %v1746_v41 = vpop.permute.xlu1 %1745 }
 0x4cb   : > { %2832 = vmatmul.mubr.msk.f32.vlgmr.msra.gmra.mrb[6].mxu1 %vm794_vm7, %v1054_v38 }
 0x4cc   : > { %2840 = vmatpush3.msra.mxu1 %v1223_v29  ;;  %2841 = vmatprep.mubr.msk.f32.mxu1 %vm3094_vm6, %v3093_v48 }
 0x4cd   : > { %2849 = vmatprep.subr.mxu1 %v3093_v48 }
 0x4ee   : > { %v1219_v39 = vpop.xlane.xlu0 %1218 }
 0x4ef   : > { %3035 = vrcp.f32 %v1219_v39 }
 0x4f0   : > { %3037 = vrcp.f32 %v1386_v53 }
 0x4f2   : > { %v1575_v40 = vpop.xlane.xlu0 %1574 }
 0x4f3   : > { %3039 = vrcp.f32 %v1575_v40 }
 0x4f6   : > { %v1909_v44 = vpop.xlane.xlu0 %1908 }
 0x4f9   : > { %v3036_v42 = vpop.eup %3035 }
 0x4fa   : > { %v1221_v43 = vmul.f32 %v3036_v42, %v3022_v17  ;;  %v1742_v45 = vpop.xlane.xlu1 %1741  ;;  %v3038_v46 = vpop.eup %3037 }
 0x4fb   : > { %3041 = vrcp.f32 %v1742_v45  ;;  %v1388_v47 = vmul.f32 %v3038_v46, %v3389_v5  ;;  %v2171_v5 = vld [vmem:[%s3572_s28 + $0x8] sm:$0xff] }
 0x4fc   : > { %2842 = vmatmul.mubr.msk.f32.vlgmr.msra.gmra.mrb[8].mxu1 %vm794_vm7, %v1221_v43  ;;  %3043 = vrcp.f32 %v1909_v44  ;;  %v2943_v7 = vpack.c.bf16 %v2171_v5, %v2170_v4 }
 0x4fd   : > { %2850 = vmatpush3.msra.mxu1 %v1390_v30  ;;  %2851 = vmatprep.mubr.msk.f32.mxu1 %vm3094_vm6, %v3093_v48  ;;  %v3040_v49 = vpop.eup %3039 }
 0x4fe   : > { %2859 = vmatprep.subr.mxu1 %v3093_v48  ;;  %v1577_v50 = vmul.f32 %v3040_v49, %v3024_v18  ;;  %v2080_v59 = vpop.permute.xlu1 %2079  ;;  %2944 = vmatprep.subr.bf16.mxu0 %v2943_v7  ;;  %v2322_v49 = vld [vmem:[%s3238_s4] sm:$0xff] }
 0x4ff   : > { %2946 = vmatpush3.bf16.msra.mxu0 %v2943_v7 }
 0x500   : > { %2852 = vmatmul.mubr.msk.f32.vlgmr.msra.gmra.mrb[10].mxu1 %vm794_vm7, %v1388_v47  ;;  %2948 = vmatprep.subr.bf16.mxu0 %v2947_v11 }
 0x501   : > { %2860 = vmatpush3.msra.mxu1 %v1579_v31  ;;  %2861 = vmatprep.mubr.msk.f32.mxu1 %vm3094_vm6, %v3093_v48 }
 0x502   : > { %v2076_v51 = vpop.xlane.xlu0 %2075  ;;  %2869 = vmatprep.subr.mxu1 %v3093_v48 }
 0x503   : > { %3045 = vrcp.f32 %v2076_v51  ;;  %2950 = vmatpush3.bf16.msra.mxu0 %v2947_v11  ;;  %v2324_v51 = vld [vmem:[%s3238_s4 + $0x10] sm:$0xff] }
 0x504   : > { %2862 = vmatmul.mubr.msk.f32.vlgmr.msra.gmra.mrb[12].mxu1 %vm794_vm7, %v1577_v50  ;;  %v2323_v50 = vld [vmem:[%s3238_s4 + $0x8] sm:$0xff] }
 0x505   : > { %v3042_v54 = vpop.eup %3041  ;;  %2870 = vmatpush3.msra.mxu1 %v1746_v41  ;;  %2871 = vmatprep.mubr.msk.f32.mxu1 %vm3094_vm6, %v3093_v48 }
 0x506   : > { %v1744_v55 = vmul.f32 %v3042_v54, %v3028_v25  ;;  %v1913_v56 = vpop.permute.xlu0 %1912  ;;  %2879 = vmatprep.subr.mxu1 %v3093_v48  ;;  %v3044_v57 = vpop.eup %3043  ;;  %v2951_v54 = vpack.c.bf16 %v2323_v50, %v2322_v49 }
 0x507   : > { %v1911_v58 = vmul.f32 %v3044_v57, %v3399_v21  ;;  %v2416_v57 = vld [vmem:[%s3248_s19] sm:$0xff] }
 0x508   : > { %2872 = vmatmul.mubr.msk.f32.vlgmr.msra.gmra.mrb[14].mxu1 %vm794_vm7, %v1744_v55  ;;  %v2325_v55 = vld [vmem:[%s3238_s4 + $0x18] sm:$0xff] }
 0x509   : > { %2880 = vmatpush3.msra.mxu1 %v1913_v56  ;;  %2881 = vmatprep.mubr.msk.f32.mxu1 %vm3094_vm6, %v3093_v48  ;;  %v2955_v56 = vpack.c.bf16 %v2325_v55, %v2324_v51 }
 0x50a   : > { %2889 = vmatprep.subr.mxu1 %v3093_v48 }
 0x50c   : > { %2882 = vmatmul.mubr.msk.f32.vlgmr.msra.gmra.mrb[16].mxu1 %vm794_vm7, %v1911_v58  ;;  %v2417_v58 = vld [vmem:[%s3248_s19 + $0x8] sm:$0xff] }
 0x50d   : > { %v3046_v60 = vpop.eup %3045  ;;  %2890 = vmatpush3.msra.mxu1 %v2080_v59  ;;  %2891 = vmatprep.mubr.msk.f32.mxu1 %vm3094_vm6, %v3093_v48  ;;  %v2418_v59 = vld [vmem:[%s3248_s19 + $0x10] sm:$0xff] }
 0x50e   : > { %v2078_v61 = vmul.f32 %v3046_v60, %v3404_v27  ;;  %2952 = vmatprep.subr.bf16.mxu1 %v2951_v54  ;;  %v2959_v60 = vpack.c.bf16 %v2417_v58, %v2416_v57 }
 0x510   : > { %2892 = vmatmul.mubr.msk.f32.vlgmr.msra.gmra.mrb[18].mxu1 %vm794_vm7, %v2078_v61  ;;  %v2419_v61 = vld [vmem:[%s3248_s19 + $0x18] sm:$0xff]  ;;  %2960 = vmatprep.subr.bf16.mxu0 %v2959_v60 }
 0x511   : > { %2954 = vmatpush3.bf16.msra.mxu1 %v2951_v54 }
 0x512   : > { %2956 = vmatprep.subr.bf16.mxu1 %v2955_v56 }
 0x515   : > { %2958 = vmatpush3.bf16.msra.mxu1 %v2955_v56 }
 0x59a   : > { %v960_v62 = vpop.f32.mrb[4].mxu1 }
 0x59b   : > { %v2823_v63 = vpop.f32.mrb[5].mxu1 }
 0x59c   : > { %v2420_v63 = vld [vmem:[%s3248_s19 + $0x20] sm:$0xff] }
 0x59e   : > { %v1127_v0 = vpop.f32.mrb[6].mxu1 }
 0x59f   : > { %1466 = vrot.lane.b32.xlu0 %v1127_v0, %s3106_s16  ;;  %v2833_v1 = vpop.f32.mrb[7].mxu1  ;;  %v2421_v0 = vld [vmem:[%s3248_s19 + $0x28] sm:$0xff] }
 0x5a0   : > { %v2967_v1 = vpack.c.bf16 %v2421_v0, %v2420_v63 }
 0x5cf   : > { %v1294_v6 = vpop.f32.mrb[8].mxu1 }
 0x5d0   : > { %1470 = vrot.lane.b32.xlu1 %v1294_v6, %s3107_s17  ;;  %v2843_v48 = vpop.f32.mrb[9].mxu1 }
 0x5d3   : > { %v1461_v10 = vpop.f32.mrb[10].mxu1 }
 0x5d4   : > { %1474 = vrot.lane.b32.xlu1 %v1461_v10, %s3108_s14  ;;  %v2853_v12 = vpop.f32.mrb[11].mxu1 }
 0x5d7   : > { %v1650_v13 = vpop.f32.mrb[12].mxu1 }
 0x5d8   : > { %v2863_v14 = vpop.f32.mrb[13].mxu1 }
 0x5db   : > { %v1817_v15 = vpop.f32.mrb[14].mxu1 }
 0x5dc   : > { %2156 = vrot.lane.b32.xlu0 %v1817_v15, %s3106_s16  ;;  %v2873_v16 = vpop.f32.mrb[15].mxu1 }
 0x5df   : > { %v1984_v17 = vpop.f32.mrb[16].mxu1 }
 0x5e0   : > { %2160 = vrot.lane.b32.xlu0 %v1984_v17, %s3107_s17  ;;  %v2883_v52 = vpop.f32.mrb[17].mxu1 }
 0x5e3   : > { %v2151_v18 = vpop.f32.mrb[18].mxu1 }
 0x5e4   : > { %2164 = vrot.lane.b32.xlu1 %v2151_v18, %s3108_s14  ;;  %v2893_v19 = vpop.f32.mrb[19].mxu1  ;;  %v2726_v18 = vld [vmem:[%s606_s1] ss:$0 sm:$0xff] }
 0x611   : > { %v1467_v20 = vpop.permute.xlu0 %1466 }
 0x612   : > { %v1477_v22 = vsel %vm794_vm7, %v960_v62, %v1467_v20  ;;  %v2963_v62 = vpack.c.bf16 %v2419_v61, %v2418_v59 }
 0x642   : > { %v1471_v21 = vpop.permute.xlu1 %1470 }
 0x643   : > { %v1479_v23 = vsel %vm1478_vm8, %v1477_v22, %v1471_v21  ;;  %v2727_v21 = vld [vmem:[%s609_s25] ss:$0 sm:$0xff] }
 0x646   : > { %v1475_v24 = vpop.permute.xlu1 %1474 }
 0x647   : > { %v1481_v25 = vsel %vm1480_vm9, %v1479_v23, %v1475_v24 }
 0x648   : > { %2902 = vmatprep.mubr.msk.f32.mxu0 %vm641_vm1, %v1481_v25 }
 0x64e   : > { %v2157_v26 = vpop.permute.xlu0 %2156 }
 0x64f   : > { %v2167_v28 = vsel %vm794_vm7, %v1650_v13, %v2157_v26 }
 0x652   : > { %v2161_v27 = vpop.permute.xlu0 %2160 }
 0x653   : > { %v2168_v29 = vsel %vm1478_vm8, %v2167_v28, %v2161_v27  ;;  %v2422_v28 = vld [vmem:[%s3248_s19 + $0x30] sm:$0xff] }
 0x656   : > { %v2165_v30 = vpop.permute.xlu1 %2164 }
 0x657   : > { %v2169_v31 = vsel %vm1480_vm9, %v2168_v29, %v2165_v30  ;;  %v2423_v29 = vld [vmem:[%s3248_s19 + $0x38] sm:$0xff] }
 0x658   : > { %2903 = vmatmul.mubr.msk.f32.vlgmr.msra.gmra.mrb[14].mxu0 %vm641_vm1, %v2169_v31  ;;  %v2971_v30 = vpack.c.bf16 %v2423_v29, %v2422_v28  ;;  %v2728_v31 = vld [vmem:[%s617_s6] ss:$0 sm:$0xff] }
 0x659   : > { %2962 = vmatpush3.bf16.msra.mxu0 %v2959_v60 }
 0x65a   : > { %2964 = vmatprep.subr.bf16.mxu0 %v2963_v62 }
 0x65d   : > { %2966 = vmatpush3.bf16.msra.mxu0 %v2963_v62 }
 0x65e   : > { %2968 = vmatprep.subr.bf16.mxu0 %v2967_v1 }
 0x661   : > { %2970 = vmatpush3.bf16.msra.mxu0 %v2967_v1 }
 0x662   : > { %2972 = vmatprep.subr.bf16.mxu0 %v2971_v30 }
 0x665   : > { %2974 = vmatpush3.bf16.msra.mxu0 %v2971_v30 }
 0x72b   : > { %v2904_v33 = vpop.f32.mrb[14].mxu0 }
 0x72c   : > { %v2259_v34 = vadd.f32 %v2904_v33, %v2723_v32  ;;  %v2253_v35 = vpop.f32.mrb[15].mxu0 }
 0x72d   : > { %v2254_v36 = vadd.f32 %v2723_v32, %v2253_v35 }
 0x72e   : > { %v3460_v37 = vadd.f32 %v2259_v34, %v3263_v3 }
 0x72f   : > { %v3463_v38 = vadd.f32 %v2254_v36, %v3261_v2 }
 0x730   : > { %v2269_v53 = vsel %vm641_vm1, %v3460_v37, 0.0 }
 0x731   : > { %2270 = vadd.xlane.f32.xlu1 %v2269_v53  ;;  %v2266_v39 = vsel %vm641_vm1, %v3463_v38, 0.0 }
 0x732   : > { %2267 = vadd.xlane.f32.xlu0 %v2266_v39  ;;  %v2731_v39 = vld [vmem:[%s625_s23] ss:$0 sm:$0xff] }
 0x7be   : > { %v2271_v40 = vpop.xlane.xlu1 %2270 }
 0x7bf   : > { %v2273_v41 = vmul.f32 0.03125, %v2271_v40  ;;  %v2268_v42 = vpop.xlane.xlu0 %2267 }
 0x7c0   : > { %v2272_v3 = vmul.f32 0.03125, %v2268_v42 }
 0x7c1   : > { %v2275_v43 = vsub.f32 %v3460_v37, %v2273_v41 }
 0x7c2   : > { %v2274_v2 = vsub.f32 %v3463_v38, %v2272_v3 }
 0x7c3   : > { %v2277_v46 = vmul.f32 %v2275_v43, %v2275_v43  ;;  %v2311_v23 = vmul.f32 %v2726_v18, %v2275_v43 }
 0x7c4   : > { %v2276_v44 = vmul.f32 %v2274_v2, %v2274_v2  ;;  %v2310_v19 = vmul.f32 %v2726_v18, %v2274_v2 }
 0x7c5   : > { %v2281_v47 = vsel %vm641_vm1, %v2277_v46, 0.0 }
 0x7c6   : > { %v2278_v45 = vsel %vm641_vm1, %v2276_v44, 0.0 }
 0x7c7   : > { %2279 = vadd.xlane.f32.xlu0 %v2278_v45 }
 0x7cb   : > { %2282 = vadd.xlane.f32.xlu0 %v2281_v47 }
 0x854   : > { %v2280_v4 = vpop.xlane.xlu0 %2279 }
 0x855   : > { %v2284_v5 = vmul.f32 0.032258064, %v2280_v4 }
 0x857   : > { %3047 = vrsqrt.f32 %v2284_v5  ;;  %vm2288_vm10 = vcmp.eq.f32.partialorder %v2284_v5, inf  ;;  %v2291_v9 = vand.u32 2147483648, %v2284_v5  ;;  %vm2290_vm11 = vcmp.eq.f32.partialorder %v2284_v5, 0.0 }
 0x858   : > { %v2283_v6 = vpop.xlane.xlu0 %2282 }
 0x859   : > { %v2285_v7 = vmul.f32 0.032258064, %v2283_v6 }
 0x85b   : > { %3049 = vrsqrt.f32 %v2285_v7  ;;  %vm2295_vm12 = vcmp.eq.f32.partialorder %v2285_v7, inf  ;;  %v2298_v15 = vand.u32 2147483648, %v2285_v7  ;;  %vm2297_vm13 = vcmp.eq.f32.partialorder %v2285_v7, 0.0 }
 0x861   : > { %v3048_v48 = vpop.eup %3047 }
 0x862   : > { %v2287_v8 = vmul.f32 %v3048_v48, %v2284_v5 }
 0x864   : > { %v2289_v10 = vsel %vm2288_vm10, %v2284_v5, %v2287_v8 }
 0x865   : > { %v3050_v11 = vpop.eup %3049  ;;  %v2292_v12 = vsel %vm2290_vm11, %v2291_v9, %v2289_v10 }
 0x866   : > { %v2294_v13 = vmul.f32 %v3050_v11, %v2285_v7  ;;  %v2300_v14 = vadd.f32 1e-06, %v2292_v12 }
 0x868   : > { %v2296_v16 = vsel %vm2295_vm12, %v2285_v7, %v2294_v13  ;;  %3051 = vrcp.f32 %v2300_v14 }
 0x869   : > { %v2299_v17 = vsel %vm2297_vm13, %v2298_v15, %v2296_v16 }
 0x86a   : > { %v2301_v52 = vadd.f32 1e-06, %v2299_v17 }
 0x86c   : > { %3053 = vrcp.f32 %v2301_v52 }
 0x872   : > { %v3052_v20 = vpop.eup %3051 }
 0x873   : > { %v2312_v22 = vmul.f32 %v3052_v20, %v2310_v19 }
 0x875   : > { %v2320_v24 = vadd.f32 %v2727_v21, %v2312_v22 }
 0x876   : > { %v3054_v25 = vpop.eup %3053 }
 0x877   : > { %v2313_v26 = vmul.f32 %v3054_v25, %v2311_v23  ;;  %2913 = vmatprep.mubr.msk.f32.mxu1 %vm641_vm1, %v2320_v24 }
 0x879   : > { %v2321_v27 = vadd.f32 %v2727_v21, %v2313_v26 }
 0x87b   : > { %2914 = vmatmul.mubr.msk.f32.vlgmr.msra.gmra.mrb[20].mxu1 %vm641_vm1, %v2321_v27 }
 0x94e   : > { %v2915_v32 = vpop.f32.mrb[20].mxu1 }
 0x94f   : > { %v2411_v33 = vadd.f32 %v2915_v32, %v2728_v31  ;;  %v2405_v34 = vpop.f32.mrb[21].mxu1 }
 0x950   : > { %v2406_v35 = vadd.f32 %v2728_v31, %v2405_v34 }
 0x951   : > { %v2415_v53 = vmax.f32 %v2411_v33, 0.0 }
 0x952   : > { %v2414_v36 = vmax.f32 %v2406_v35, 0.0 }
 0x954   : > { %2932 = vmatprep.mubr.msk.f32.mxu0 %vm2431_vm14, %v2414_v36 }
 0x955   : > { %2933 = vmatmul.mubr.msk.f32.vlgmr.msra.gmra.mrb[16].mxu0 %vm2431_vm14, %v2415_v53 }
 0xa28   : > { %v2934_v40 = vpop.f32.mrb[16].mxu0  ;;  %2520 = sbr.rel (%p2734_p5) target bundleno = 2607 (0xa2f), region = 84 }
 0xa29   : > { %v2510_v41 = vadd.f32 %v2934_v40, %v2731_v39  ;;  %v2504_v42 = vpop.f32.mrb[17].mxu0 }
 0xa2a   : > { %v2505_v3 = vadd.f32 %v2731_v39, %v2504_v42 }
 0xa2b   : > { %v2514_v43 = vadd.f32 %v2510_v41, %v3460_v37 }
 0xa2c   : > { %v2513_v2 = vadd.f32 %v2505_v3, %v3463_v38 }
 0xa2d   : > { %2516 = vst.msk [vmem:[#allocation2 + $0x8] sm:$0xff] %vm641_vm1, %v2514_v43  ;;  %2522 = vst.msk [vmem:[#allocation3 + $0x8] sm:$0xff] (!%p2734_p5), %vm641_vm1, %v2514_v43 }
 0xa2e   : > { %2515 = vst.msk [vmem:[#allocation2] sm:$0xff] %vm641_vm1, %v2513_v2  ;;  %2521 = vst.msk [vmem:[#allocation3] sm:$0xff] (!%p2734_p5), %vm641_vm1, %v2513_v2 }
 0xa2f PF: > { %p2979_p6 = scmp.eq.s32.totalorder %s3192_s30, 1  ;;  %s3109_s6 = smov [#allocation3]  }
 0xa30   : > { %s2529_s15 = sshll.u32 %s3109_s6, 4  ;;  %s2530_s15 = int_to_ptr.vmem [resolvable:$true] %s2529_s15 }
 0xa31   : > { %s3055_s19 = scalar_lea.vmem %s2530_s15, 256  ;;  %p3062_p10 = scmp.lt.s32.totalorder %s2530_s15, %s2530_s15 }
 0xa32   : > { %p3056_p7 = scmp.ne.s32.totalorder %s2530_s15, %s3055_s19  ;;  %p3063_p11 = scmp.lt.s32.totalorder %s3055_s19, %s3055_s19 }
 0xa34   : > { %p3057_p8 = pnand %p3056_p7, %p2979_p6  ;;  %p3064_p12 = por %p3063_p11, %p3062_p10 }
 0xa36   : > { %p3058_p9 = pneg %p3057_p8 }
 0xa38   : > { %p3065_p13 = pnand %p3064_p12, %p3058_p9 }
 0xa3a   : > { %3068 = shalt.err (!%p3065_p13)
}
 0xa3b   : > { %s3574_s14 = sld [smem:[#allocation11_spill]] }
 0xa41   : > { %s3069_s18 = scalar_lea.hbm %s3574_s14, 256 }
 0xa42   : > { %p3070_p0 = scmp.ne.s32.totalorder %s3574_s14, %s3069_s18  ;;  %p3075_p3 = scmp.lt.u32.totalorder %s3069_s18, %s3574_s14 }
 0xa44   : > { %p3071_p1 = pnand %p3070_p0, %p2979_p6 }
 0xa46   : > { %p3072_p2 = pneg %p3071_p1 }
 0xa48   : > { %p3077_p4 = pnand %p3075_p3, %p3072_p2 }
 0xa4a   : > { %3080 = shalt.err (!%p3077_p4)
}
 0xa4b   : > { %s3110_s26 = smov 128  }
 0xa4c   : > { %2976 = dma.vmem_to_hbm [thread:$0]  (%p2979_p6), %s2530_s15, 256, %s3574_s14, [#allocation4], %s3110_s26, %s3110_s26, %s3106_s16  }
 0xa4d   : > { %3086 = dma.done.wait (%p2979_p6), [#allocation4], 256  }
 0xa4e   : > { %3088 = vsyncadd (%p2979_p6), [#allocation4], 4294967040 }
 0xa4f PF: > { %s3575_s29 = sld [smem:[#allocation6_spill]] }
 0xa55   : > { %s25_s29 = sadd.s32 1, %s3575_s29  }
 0xa56   : > { %p22_p5 = scmp.ge.s32.totalorder %s25_s29, 4  }
 0xa58   :  { %24 = sbr.rel (!%p22_p5) target bundleno = 6 (0x6), region = 144 }
 0xa5f   :  { %2545 = vsyncpa [#allocation4], 1 }
 0xa60   :  { %2547 = vsyncpa [#allocation4 + $0x1], 1 }

</bundles_post_ra>
